<compile_context>
chip_gen: v7x
topology: tpu7x:2x2x1
jax: 0.10.0
libtpu: 0.0.40
codegen_flags: <defaults>
</compile_context>

<pallas_src>
import functools

import jax
import jax.numpy as jnp
from jax import lax
from jax.experimental import pallas as pl
from jax.experimental.pallas import tpu as pltpu

LANES = 128          # TPU lane width: Cout and the packed-K dim pad to this


# ------------------------------ small helpers ------------------------------ #

def _round_up(n, m):
    return -(-n // m) * m


def _pad_channels(x, c):
    padc = c - x.shape[-1]
    if padc <= 0:
        return x
    return jnp.pad(x, ((0, 0),) * (x.ndim - 1) + ((0, padc),))


@functools.lru_cache(maxsize=1)
def _vmem_limit_bytes():
    """Generation-aware scoped-VMEM cap (review #7). Actual usage is O(tile),
    far below any of these, so the unknown-device fallback is safe."""
    kind = ""
    try:
        kind = jax.devices()[0].device_kind.lower()
    except Exception:
        pass
    if ("v5 lite" in kind) or ("v5e" in kind) or ("v6" in kind):
        return 96 * 1024 * 1024        # 128 MiB physical on v5e / v6e
    return 40 * 1024 * 1024            # conservative for v7x (64 MiB) / unknown


def _pick_tile_m(m, target=1024):
    """M-row tile: ~512-2048 rows, multiple of 8, minimal pad waste."""
    n = pl.cdiv(m, target)
    return _round_up(pl.cdiv(m, n), 8)


def _im2col(x, k, stride, pad, k_pad):
    """(B,H,W,C) -> lane-dense K-packed GEMM input (B*Ho*Wo, k_pad) bf16.

    Row (b, ho, wo) holds the (kh, kw, c)-ordered patch values; the zero K tail
    (k*k*C .. k_pad) matches the zero rows padded onto the weight matrix."""
    B, H, W, C = x.shape
    Ho = (H + 2 * pad - k) // stride + 1
    Wo = (W + 2 * pad - k) // stride + 1
    xp = jnp.pad(x, ((0, 0), (pad, pad), (pad, pad), (0, 0)))
    taps = []
    for kh in range(k):
        for kw in range(k):
            taps.append(xp[:, kh:kh + stride * (Ho - 1) + 1:stride,
                           kw:kw + stride * (Wo - 1) + 1:stride, :])
    cols = jnp.concatenate(taps, axis=-1).reshape(B * Ho * Wo, k * k * C)
    if k_pad > k * k * C:
        cols = jnp.pad(cols, ((0, 0), (0, k_pad - k * k * C)))
    return cols, Ho, Wo


# ----------------------------- Pallas kernels ------------------------------ #

def _gemm_bn_lrelu_kernel(x_ref, w_ref, g_ref, b_ref, o_ref, sum_ref, ssq_ref,
                          *, eps, neg_slope, inv_count):
    """Fused [K-packed conv GEMM] -> BatchNorm2d(train) -> LeakyReLU(0.2).

    grid = (2, n_m).  Phase 0: per-channel sum / sum-of-squares over all M
    tiles (exact full-batch statistics despite M tiling); no output is written
    and no output block is flushed (the out index map pins phase 0 to block 0).
    Phase 1: recompute the GEMM tile (cheaper than an extra HBM round-trip of
    the raw activation) and apply normalisation + activation.
    Note: var = E[y^2]-E[y]^2 in one f32 sweep; with the conv bias removed the
    channel means stay modest, and the clamp guards the rsqrt.
    """
    phase = pl.program_id(0)
    mi = pl.program_id(1)

    # One bf16 MXU GEMM, f32 accumulation.  K depth = k*k*Cin (padded to
    # 128/256), Cout lane-padded to 128.
    y = jnp.dot(x_ref[...], w_ref[...], preferred_element_type=jnp.float32)

    @pl.when(jnp.logical_and(phase == 0, mi == 0))
    def _init():
        sum_ref[...] = jnp.zeros_like(sum_ref)
        ssq_ref[...] = jnp.zeros_like(ssq_ref)

    @pl.when(phase == 0)
    def _stats():
        # Zero-padded M rows contribute exactly 0 (no conv bias), so the
        # statistics stay exact with inv_count = 1 / true_count.
        sum_ref[...] += jnp.sum(y, axis=0, keepdims=True)
        ssq_ref[...] += jnp.sum(y * y, axis=0, keepdims=True)

    @pl.when(phase == 1)
    def _normalize():
        mean = sum_ref[...] * inv_count
        var = jnp.maximum(ssq_ref[...] * inv_count - mean * mean, 0.0)
        scale = g_ref[...] * lax.rsqrt(var + eps)
        shift = b_ref[...] - mean * scale
        yn = y * scale + shift
        yn = jnp.where(yn >= 0, yn, neg_slope * yn)      # LeakyReLU(0.2)
        o_ref[...] = yn.astype(o_ref.dtype)


def _gemm_avgpool_kernel(x_ref, w_ref, b_ref, o_ref, *, inv_hw):
    """Last downsample conv (no norm / activation when num_residual_blocks==0)
    with AdaptiveAvgPool2d((1,1)) + squeeze folded THROUGH the linear conv:
    average the K-packed patch rows of one batch element first, then a single
    (1, K)@(K, 128) GEMM + bias, so the (Ho, Wo, Cout) activation is never
    materialized."""
    cols = x_ref[0]                                           # (Mb_pad, K_pad) bf16
    mean = jnp.sum(cols.astype(jnp.float32), axis=0, keepdims=True) * inv_hw
    y = jnp.dot(mean.astype(jnp.bfloat16), w_ref[...],
                preferred_element_type=jnp.float32)           # (1, 128)
    o_ref[...] = (y + b_ref[...]).reshape(1, 1, LANES)


# ------------------------------ layer wrappers ------------------------------ #

def conv_bn_lrelu(x, p, *, eps=1e-5, neg_slope=0.2):
    """x: (B, H, W, Cin_true) bf16 -> (B, Ho, Wo, Cout_true) bf16."""
    B = x.shape[0]
    k, stride, k_pad = p["k"], p["stride"], p["k_pad"]
    pad = (k - 1) // 2                              # padding='same'
    cols, Ho, Wo = _im2col(x, k, stride, pad, k_pad)

    M = B * Ho * Wo
    TM = _pick_tile_m(M)
    n_m = pl.cdiv(M, TM)
    M_pad = n_m * TM
    if M_pad > M:                                   # zero rows: exact no-op for BN stats
        cols = jnp.pad(cols, ((0, M_pad - M), (0, 0)))

    kernel = functools.partial(_gemm_bn_lrelu_kernel, eps=eps,
                               neg_slope=neg_slope, inv_count=1.0 / float(M))

    out = pl.pallas_call(
        kernel,
        out_shape=jax.ShapeDtypeStruct((M_pad, LANES), jnp.bfloat16),
        grid_spec=pltpu.PrefetchScalarGridSpec(
            num_scalar_prefetch=0,
            grid=(2, n_m),
            in_specs=[
                pl.BlockSpec((TM, k_pad), lambda ph, m: (m, 0)),     # streamed tiles
                pl.BlockSpec((k_pad, LANES), lambda ph, m: (0, 0)),  # resident weight
                pl.BlockSpec((1, LANES), lambda ph, m: (0, 0)),      # gamma
                pl.BlockSpec((1, LANES), lambda ph, m: (0, 0)),      # beta
            ],
            # Phase 0 pins every step to output block 0 (never written, never
            # flushed mid-phase); phase 1 writes each block exactly once ->
            # single HBM writeback of the layer output (review #2/#3).
            out_specs=pl.BlockSpec((TM, LANES), lambda ph, m: (m * ph, 0)),
            scratch_shapes=[pltpu.VMEM((1, LANES), jnp.float32),     # sum
                            pltpu.VMEM((1, LANES), jnp.float32)],    # sum of squares
        ),
        compiler_params=pltpu.CompilerParams(
            # Full-batch BN statistics make both axes sequential; a 'parallel'
            # M axis would give each core partial (wrong) stats.
            # TODO(synk): v7x 2-TC via per-core partial stats + CMEM combine.
            dimension_semantics=("arbitrary", "arbitrary"),
            vmem_limit_bytes=_vmem_limit_bytes()),
    )(cols, p["w"], p["gamma"], p["beta"])

    return out[:M, :p["cout_true"]].reshape(B, Ho, Wo, p["cout_true"])


def conv_avgpool(x, p):
    """x: (B, H, W, Cin_true) bf16 -> (B, 1, 128) f32 pooled latent (padded lanes)."""
    B = x.shape[0]
    k, stride, k_pad = p["k"], p["stride"], p["k_pad"]
    pad = (k - 1) // 2
    cols, Ho, Wo = _im2col(x, k, stride, pad, k_pad)

    Mb = Ho * Wo
    Mb_pad = _round_up(Mb, 8)
    cols = cols.reshape(B, Mb, k_pad)
    if Mb_pad > Mb:
        cols = jnp.pad(cols, ((0, 0), (0, Mb_pad - Mb), (0, 0)))

    kernel = functools.partial(_gemm_avgpool_kernel, inv_hw=1.0 / float(Mb))

    return pl.pallas_call(
        kernel,
        out_shape=jax.ShapeDtypeStruct((B, 1, LANES), jnp.float32),
        grid_spec=pltpu.PrefetchScalarGridSpec(
            num_scalar_prefetch=0,
            grid=(B,),
            in_specs=[
                pl.BlockSpec((1, Mb_pad, k_pad), lambda b: (b, 0, 0)),
                pl.BlockSpec((k_pad, LANES), lambda b: (0, 0)),
                pl.BlockSpec((1, LANES), lambda b: (0, 0)),
            ],
            out_specs=pl.BlockSpec((1, 1, LANES), lambda b: (b, 0, 0)),
        ),
        compiler_params=pltpu.CompilerParams(
            # No batch statistics here -> the batch axis can be sharded across
            # v7x's two TensorCores (harmless on v5e/v6e).
            dimension_semantics=("parallel",),
            vmem_limit_bytes=_vmem_limit_bytes()),
    )(cols, p["w"], p["b"])


# ------------------------------- parameters -------------------------------- #

def init_params(key, in_channels, num_downsample, latent_dim,
                kernel_size=3, first_kernel_size=7):
    """Synthetic parameters mirroring VanillaEncoder's layer layout, converted
    to the K-packed GEMM layout: weight (k*k*Cin, Cout) zero-padded to
    (K_pad, 128) bf16 (review #1)."""
    start_channels = int(round(latent_dim / 2 ** num_downsample))
    layer_defs = [dict(cin=in_channels, cout=start_channels,
                       k=first_kernel_size, stride=1, last=False)]
    in_nc = start_channels
    for i in range(num_downsample):
        is_last = i == num_downsample - 1
        out_nc = latent_dim if is_last else min(in_nc * 2, latent_dim)
        # num_residual_blocks == 0 -> last downsample has no norm / activation
        layer_defs.append(dict(cin=in_nc, cout=out_nc, k=kernel_size,
                               stride=2, last=is_last))
        in_nc = out_nc

    params = []
    for d in layer_defs:
        key, kw_, kb_, kg_, kbt_ = jax.random.split(key, 5)
        cin, cout, k = d["cin"], d["cout"], d["k"]
        assert cout <= LANES
        kk_cin = k * k * cin
        k_pad = _round_up(kk_cin, LANES)
        # PyTorch Conv2d weight layout (Cout, Cin, KH, KW)
        w_pt = jax.random.normal(kw_, (cout, cin, k, k), jnp.float32)
        w_pt = w_pt / jnp.sqrt(float(kk_cin))
        # (Cout,Cin,KH,KW) -> (KH,KW,Cin,Cout) -> (k*k*Cin, Cout), padded to
        # (K_pad, 128), bf16 MXU feed.  Padded rows/lanes stay exactly 0.
        w = jnp.transpose(w_pt, (2, 3, 1, 0)).reshape(kk_cin, cout)
        w = jnp.pad(w, ((0, k_pad - kk_cin), (0, LANES - cout))).astype(jnp.bfloat16)

        entry = dict(w=w, k=k, stride=d["stride"], last=d["last"],
                     cout_true=cout, k_pad=k_pad)
        if d["last"]:
            b = 0.1 * jax.random.normal(kb_, (cout,), jnp.float32)
            entry["b"] = _pad_channels(b.reshape(1, -1), LANES)
        else:
            # Conv bias omitted on purpose: train-mode BatchNorm subtracts the
            # batch mean, so a constant per-channel bias cancels exactly.
            gamma = 1.0 + 0.1 * jax.random.normal(kg_, (cout,), jnp.float32)
            beta = 0.1 * jax.random.normal(kbt_, (cout,), jnp.float32)
            entry["gamma"] = _pad_channels(gamma.reshape(1, -1), LANES)
            entry["beta"] = _pad_channels(beta.reshape(1, -1), LANES)
        params.append(entry)
    return params


# --------------------------------- forward --------------------------------- #

def vanilla_encoder_1d_forward(x_nchw, params):
    """Forward of VanillaEncoder1D. Input: PyTorch NCHW. Output: (B, latent_dim)."""
    x = jnp.transpose(x_nchw, (0, 2, 3, 1)).astype(jnp.bfloat16)   # NCHW -> NHWC bf16
    for p in params[:-1]:
        x = conv_bn_lrelu(x, p)
    last = params[-1]
    y = conv_avgpool(x, last)
    # TODO(synk): pool='fc' (Flatten+Linear), num_residual_blocks>0 and non-batch
    # norm types are not implemented; default 'average' pooling path only.
    return y[:, 0, :last["cout_true"]]              # drop lane padding -> (B, latent_dim)


# ----------------------------------- main ----------------------------------- #

if __name__ == "__main__":
    key = jax.random.PRNGKey(0)
    kx, kp = jax.random.split(key)

    B, C, H, W = 2, 4, 16, 16           # PyTorch NCHW input
    num_downsample, latent_dim = 2, 32  # start_channels = round(32 / 4) = 8

    x = jax.random.normal(kx, (B, C, H, W), jnp.float32)
    params = init_params(kp, C, num_downsample, latent_dim)

    fwd = jax.jit(functools.partial(vanilla_encoder_1d_forward, params=params))
    out = jax.block_until_ready(fwd(x))

    assert out.shape == (B, latent_dim), out.shape
    assert bool(jnp.all(jnp.isfinite(out)))
    print("KERNEL_OK")
</pallas_src>

<mosaic_0001>
module attributes {stable_mosaic.version = 11 : i64} {
  func.func @_gemm_bn_lrelu_kernel(%arg0: i32, %arg1: i32, %arg2: memref<512x256xbf16, #tpu.memory_space<vmem>>, %arg3: memref<256x128xbf16, #tpu.memory_space<vmem>>, %arg4: memref<1x128xf32, #tpu.memory_space<vmem>>, %arg5: memref<1x128xf32, #tpu.memory_space<vmem>>, %arg6: memref<512x128xbf16, #tpu.memory_space<vmem>>, %arg7: memref<1x128xf32, #tpu.memory_space<vmem>>, %arg8: memref<1x128xf32, #tpu.memory_space<vmem>>) attributes {dimension_semantics = [#tpu.dimension_semantics<arbitrary>, #tpu.dimension_semantics<arbitrary>], iteration_bounds = array<i64: 2, 1>, scalar_prefetch = 0 : i64, scratch_operands = 2 : i64, tpu.core_type = #tpu.core_type<tc>, window_params = [{transform_indices = @transform_0, window_bounds = array<i64: 512, 256>}, {pipeline_mode = #tpu.pipeline_mode<synchronous>, transform_indices = @transform_1, window_bounds = array<i64: 256, 128>}, {pipeline_mode = #tpu.pipeline_mode<synchronous>, transform_indices = @transform_2, window_bounds = array<i64: 1, 128>}, {pipeline_mode = #tpu.pipeline_mode<synchronous>, transform_indices = @transform_3, window_bounds = array<i64: 1, 128>}, {transform_indices = @transform_4, window_bounds = array<i64: 512, 128>}]} {
    %c0 = arith.constant 0 : index
    %c0_0 = arith.constant 0 : index
    %0 = vector.load %arg2[%c0, %c0_0] : memref<512x256xbf16, #tpu.memory_space<vmem>>, vector<512x256xbf16>
    %c0_1 = arith.constant 0 : index
    %c0_2 = arith.constant 0 : index
    %1 = vector.load %arg3[%c0_1, %c0_2] : memref<256x128xbf16, #tpu.memory_space<vmem>>, vector<256x128xbf16>
    %cst = arith.constant dense<0.000000e+00> : vector<512x128xf32>
    %2 = tpu.matmul %0, %1, %cst {dimension_numbers = #tpu.dot_dimension_numbers<[1], [0], [0], [1], [0, 0, 1, 1], [], []>} : vector<512x256xbf16>, vector<256x128xbf16>, vector<512x128xf32> -> vector<512x128xf32>
    %c0_i32 = arith.constant 0 : i32
    %3 = arith.cmpi eq, %arg0, %c0_i32 : i32
    %c0_i32_3 = arith.constant 0 : i32
    %4 = arith.cmpi eq, %arg1, %c0_i32_3 : i32
    %5 = arith.andi %3, %4 : i1
    %6 = arith.extui %5 : i1 to i32
    %c0_i32_4 = arith.constant 0 : i32
    %7 = arith.cmpi ne, %6, %c0_i32_4 : i32
    scf.if %7 {
      %cst_8 = arith.constant 0.000000e+00 : f32
      %14 = vector.broadcast %cst_8 : f32 to vector<1x128xf32>
      %c0_9 = arith.constant 0 : index
      %c0_10 = arith.constant 0 : index
      %15 = vector.load %arg7[%c0_9, %c0_10] : memref<1x128xf32, #tpu.memory_space<vmem>>, vector<1x128xf32>
      tpu.vector_store %arg7[%c0_9, %c0_10], %14 {strides = array<i32>} : memref<1x128xf32, #tpu.memory_space<vmem>>, vector<1x128xf32>,
      %cst_11 = arith.constant 0.000000e+00 : f32
      %16 = vector.broadcast %cst_11 : f32 to vector<1x128xf32>
      %c0_12 = arith.constant 0 : index
      %c0_13 = arith.constant 0 : index
      %17 = vector.load %arg8[%c0_12, %c0_13] : memref<1x128xf32, #tpu.memory_space<vmem>>, vector<1x128xf32>
      tpu.vector_store %arg8[%c0_12, %c0_13], %16 {strides = array<i32>} : memref<1x128xf32, #tpu.memory_space<vmem>>, vector<1x128xf32>,
    } else {
    }
    %c0_i32_5 = arith.constant 0 : i32
    %8 = arith.cmpi eq, %arg0, %c0_i32_5 : i32
    %9 = arith.extui %8 : i1 to i32
    %c0_i32_6 = arith.constant 0 : i32
    %10 = arith.cmpi ne, %9, %c0_i32_6 : i32
    scf.if %10 {
      %c0_8 = arith.constant 0 : index
      %c0_9 = arith.constant 0 : index
      %14 = vector.load %arg7[%c0_8, %c0_9] : memref<1x128xf32, #tpu.memory_space<vmem>>, vector<1x128xf32>
      %cst_10 = arith.constant dense<0.000000e+00> : vector<128xf32>
      %15 = vector.multi_reduction <add>, %2, %cst_10 [0] : vector<512x128xf32> to vector<128xf32>
      %16 = vector.shape_cast %15 : vector<128xf32> to vector<1x128xf32>
      %17 = arith.addf %14, %16 : vector<1x128xf32>
      %c0_11 = arith.constant 0 : index
      %c0_12 = arith.constant 0 : index
      %18 = vector.load %arg7[%c0_11, %c0_12] : memref<1x128xf32, #tpu.memory_space<vmem>>, vector<1x128xf32>
      tpu.vector_store %arg7[%c0_11, %c0_12], %17 {strides = array<i32>} : memref<1x128xf32, #tpu.memory_space<vmem>>, vector<1x128xf32>,
      %c0_13 = arith.constant 0 : index
      %c0_14 = arith.constant 0 : index
      %19 = vector.load %arg8[%c0_13, %c0_14] : memref<1x128xf32, #tpu.memory_space<vmem>>, vector<1x128xf32>
      %20 = arith.mulf %2, %2 : vector<512x128xf32>
      %cst_15 = arith.constant dense<0.000000e+00> : vector<128xf32>
      %21 = vector.multi_reduction <add>, %20, %cst_15 [0] : vector<512x128xf32> to vector<128xf32>
      %22 = vector.shape_cast %21 : vector<128xf32> to vector<1x128xf32>
      %23 = arith.addf %19, %22 : vector<1x128xf32>
      %c0_16 = arith.constant 0 : index
      %c0_17 = arith.constant 0 : index
      %24 = vector.load %arg8[%c0_16, %c0_17] : memref<1x128xf32, #tpu.memory_space<vmem>>, vector<1x128xf32>
      tpu.vector_store %arg8[%c0_16, %c0_17], %23 {strides = array<i32>} : memref<1x128xf32, #tpu.memory_space<vmem>>, vector<1x128xf32>,
    } else {
    }
    %c1_i32 = arith.constant 1 : i32
    %11 = arith.cmpi eq, %arg0, %c1_i32 : i32
    %12 = arith.extui %11 : i1 to i32
    %c0_i32_7 = arith.constant 0 : i32
    %13 = arith.cmpi ne, %12, %c0_i32_7 : i32
    scf.if %13 {
      %c0_8 = arith.constant 0 : index
      %c0_9 = arith.constant 0 : index
      %14 = vector.load %arg7[%c0_8, %c0_9] : memref<1x128xf32, #tpu.memory_space<vmem>>, vector<1x128xf32>
      %cst_10 = arith.constant 0.001953125 : f32
      %15 = vector.broadcast %cst_10 : f32 to vector<1x128xf32>
      %16 = arith.mulf %14, %15 : vector<1x128xf32>
      %c0_11 = arith.constant 0 : index
      %c0_12 = arith.constant 0 : index
      %17 = vector.load %arg8[%c0_11, %c0_12] : memref<1x128xf32, #tpu.memory_space<vmem>>, vector<1x128xf32>
      %cst_13 = arith.constant 0.001953125 : f32
      %18 = vector.broadcast %cst_13 : f32 to vector<1x128xf32>
      %19 = arith.mulf %17, %18 : vector<1x128xf32>
      %20 = arith.mulf %16, %16 : vector<1x128xf32>
      %21 = arith.subf %19, %20 : vector<1x128xf32>
      %cst_14 = arith.constant 0.000000e+00 : f32
      %22 = vector.broadcast %cst_14 : f32 to vector<1x128xf32>
      %23 = arith.maximumf %21, %22 : vector<1x128xf32>
      %c0_15 = arith.constant 0 : index
      %c0_16 = arith.constant 0 : index
      %24 = vector.load %arg4[%c0_15, %c0_16] : memref<1x128xf32, #tpu.memory_space<vmem>>, vector<1x128xf32>
      %cst_17 = arith.constant 9.99999974E-6 : f32
      %25 = vector.broadcast %cst_17 : f32 to vector<1x128xf32>
      %26 = arith.addf %23, %25 : vector<1x128xf32>
      %27 = math.rsqrt %26 : vector<1x128xf32>
      %28 = arith.mulf %24, %27 : vector<1x128xf32>
      %c0_18 = arith.constant 0 : index
      %c0_19 = arith.constant 0 : index
      %29 = vector.load %arg5[%c0_18, %c0_19] : memref<1x128xf32, #tpu.memory_space<vmem>>, vector<1x128xf32>
      %30 = arith.mulf %16, %28 : vector<1x128xf32>
      %31 = arith.subf %29, %30 : vector<1x128xf32>
      %32 = vector.broadcast %28 : vector<1x128xf32> to vector<512x128xf32>
      %33 = arith.mulf %2, %32 : vector<512x128xf32>
      %34 = vector.broadcast %31 : vector<1x128xf32> to vector<512x128xf32>
      %35 = arith.addf %33, %34 : vector<512x128xf32>
      %cst_20 = arith.constant 0.000000e+00 : f32
      %36 = vector.broadcast %cst_20 : f32 to vector<512x128xf32>
      %37 = arith.cmpf oge, %35, %36 : vector<512x128xf32>
      %cst_21 = arith.constant 2.000000e-01 : f32
      %38 = vector.broadcast %cst_21 : f32 to vector<512x128xf32>
      %39 = arith.mulf %38, %35 : vector<512x128xf32>
      %40 = arith.select %37, %35, %39 : vector<512x128xi1>, vector<512x128xf32>
      %41 = arith.truncf %40 : vector<512x128xf32> to vector<512x128xbf16>
      %c0_22 = arith.constant 0 : index
      %c0_23 = arith.constant 0 : index
      %42 = vector.load %arg6[%c0_22, %c0_23] : memref<512x128xbf16, #tpu.memory_space<vmem>>, vector<512x128xbf16>
      tpu.vector_store %arg6[%c0_22, %c0_23], %41 {strides = array<i32>} : memref<512x128xbf16, #tpu.memory_space<vmem>>, vector<512x128xbf16>,
    } else {
    }
    return
  }
  func.func @transform_0(%arg0: i32, %arg1: i32) -> (i32, i32) {
    %c0_i32 = arith.constant 0 : i32
    %c0_i32_0 = arith.constant 0 : i32
    return %arg1, %c0_i32 : i32, i32
  }
  func.func @transform_1(%arg0: i32, %arg1: i32) -> (i32, i32) {
    %c0_i32 = arith.constant 0 : i32
    %c0_i32_0 = arith.constant 0 : i32
    %c0_i32_1 = arith.constant 0 : i32
    return %c0_i32, %c0_i32_0 : i32, i32
  }
  func.func @transform_2(%arg0: i32, %arg1: i32) -> (i32, i32) {
    %c0_i32 = arith.constant 0 : i32
    %c0_i32_0 = arith.constant 0 : i32
    %c0_i32_1 = arith.constant 0 : i32
    return %c0_i32, %c0_i32_0 : i32, i32
  }
  func.func @transform_3(%arg0: i32, %arg1: i32) -> (i32, i32) {
    %c0_i32 = arith.constant 0 : i32
    %c0_i32_0 = arith.constant 0 : i32
    %c0_i32_1 = arith.constant 0 : i32
    return %c0_i32, %c0_i32_0 : i32, i32
  }
  func.func @transform_4(%arg0: i32, %arg1: i32) -> (i32, i32) {
    %0 = arith.muli %arg1, %arg0 : i32
    %c0_i32 = arith.constant 0 : i32
    %c0_i32_0 = arith.constant 0 : i32
    return %0, %c0_i32 : i32, i32
  }
}

module attributes {stable_mosaic.version = 11 : i64} {
  func.func @_gemm_bn_lrelu_kernel(%arg0: i32, %arg1: i32, %arg2: memref<128x128xbf16, #tpu.memory_space<vmem>>, %arg3: memref<128x128xbf16, #tpu.memory_space<vmem>>, %arg4: memref<1x128xf32, #tpu.memory_space<vmem>>, %arg5: memref<1x128xf32, #tpu.memory_space<vmem>>, %arg6: memref<128x128xbf16, #tpu.memory_space<vmem>>, %arg7: memref<1x128xf32, #tpu.memory_space<vmem>>, %arg8: memref<1x128xf32, #tpu.memory_space<vmem>>) attributes {dimension_semantics = [#tpu.dimension_semantics<arbitrary>, #tpu.dimension_semantics<arbitrary>], iteration_bounds = array<i64: 2, 1>, scalar_prefetch = 0 : i64, scratch_operands = 2 : i64, tpu.core_type = #tpu.core_type<tc>, window_params = [{transform_indices = @transform_0, window_bounds = array<i64: 128, 128>}, {pipeline_mode = #tpu.pipeline_mode<synchronous>, transform_indices = @transform_1, window_bounds = array<i64: 128, 128>}, {pipeline_mode = #tpu.pipeline_mode<synchronous>, transform_indices = @transform_2, window_bounds = array<i64: 1, 128>}, {pipeline_mode = #tpu.pipeline_mode<synchronous>, transform_indices = @transform_3, window_bounds = array<i64: 1, 128>}, {transform_indices = @transform_4, window_bounds = array<i64: 128, 128>}]} {
    %c0 = arith.constant 0 : index
    %c0_0 = arith.constant 0 : index
    %0 = vector.load %arg2[%c0, %c0_0] : memref<128x128xbf16, #tpu.memory_space<vmem>>, vector<128x128xbf16>
    %c0_1 = arith.constant 0 : index
    %c0_2 = arith.constant 0 : index
    %1 = vector.load %arg3[%c0_1, %c0_2] : memref<128x128xbf16, #tpu.memory_space<vmem>>, vector<128x128xbf16>
    %cst = arith.constant dense<0.000000e+00> : vector<128x128xf32>
    %2 = tpu.matmul %0, %1, %cst {dimension_numbers = #tpu.dot_dimension_numbers<[1], [0], [0], [1], [0, 0, 1, 1], [], []>} : vector<128x128xbf16>, vector<128x128xbf16>, vector<128x128xf32> -> vector<128x128xf32>
    %c0_i32 = arith.constant 0 : i32
    %3 = arith.cmpi eq, %arg0, %c0_i32 : i32
    %c0_i32_3 = arith.constant 0 : i32
    %4 = arith.cmpi eq, %arg1, %c0_i32_3 : i32
    %5 = arith.andi %3, %4 : i1
    %6 = arith.extui %5 : i1 to i32
    %c0_i32_4 = arith.constant 0 : i32
    %7 = arith.cmpi ne, %6, %c0_i32_4 : i32
    scf.if %7 {
      %cst_8 = arith.constant 0.000000e+00 : f32
      %14 = vector.broadcast %cst_8 : f32 to vector<1x128xf32>
      %c0_9 = arith.constant 0 : index
      %c0_10 = arith.constant 0 : index
      %15 = vector.load %arg7[%c0_9, %c0_10] : memref<1x128xf32, #tpu.memory_space<vmem>>, vector<1x128xf32>
      tpu.vector_store %arg7[%c0_9, %c0_10], %14 {strides = array<i32>} : memref<1x128xf32, #tpu.memory_space<vmem>>, vector<1x128xf32>,
      %cst_11 = arith.constant 0.000000e+00 : f32
      %16 = vector.broadcast %cst_11 : f32 to vector<1x128xf32>
      %c0_12 = arith.constant 0 : index
      %c0_13 = arith.constant 0 : index
      %17 = vector.load %arg8[%c0_12, %c0_13] : memref<1x128xf32, #tpu.memory_space<vmem>>, vector<1x128xf32>
      tpu.vector_store %arg8[%c0_12, %c0_13], %16 {strides = array<i32>} : memref<1x128xf32, #tpu.memory_space<vmem>>, vector<1x128xf32>,
    } else {
    }
    %c0_i32_5 = arith.constant 0 : i32
    %8 = arith.cmpi eq, %arg0, %c0_i32_5 : i32
    %9 = arith.extui %8 : i1 to i32
    %c0_i32_6 = arith.constant 0 : i32
    %10 = arith.cmpi ne, %9, %c0_i32_6 : i32
    scf.if %10 {
      %c0_8 = arith.constant 0 : index
      %c0_9 = arith.constant 0 : index
      %14 = vector.load %arg7[%c0_8, %c0_9] : memref<1x128xf32, #tpu.memory_space<vmem>>, vector<1x128xf32>
      %cst_10 = arith.constant dense<0.000000e+00> : vector<128xf32>
      %15 = vector.multi_reduction <add>, %2, %cst_10 [0] : vector<128x128xf32> to vector<128xf32>
      %16 = vector.shape_cast %15 : vector<128xf32> to vector<1x128xf32>
      %17 = arith.addf %14, %16 : vector<1x128xf32>
      %c0_11 = arith.constant 0 : index
      %c0_12 = arith.constant 0 : index
      %18 = vector.load %arg7[%c0_11, %c0_12] : memref<1x128xf32, #tpu.memory_space<vmem>>, vector<1x128xf32>
      tpu.vector_store %arg7[%c0_11, %c0_12], %17 {strides = array<i32>} : memref<1x128xf32, #tpu.memory_space<vmem>>, vector<1x128xf32>,
      %c0_13 = arith.constant 0 : index
      %c0_14 = arith.constant 0 : index
      %19 = vector.load %arg8[%c0_13, %c0_14] : memref<1x128xf32, #tpu.memory_space<vmem>>, vector<1x128xf32>
      %20 = arith.mulf %2, %2 : vector<128x128xf32>
      %cst_15 = arith.constant dense<0.000000e+00> : vector<128xf32>
      %21 = vector.multi_reduction <add>, %20, %cst_15 [0] : vector<128x128xf32> to vector<128xf32>
      %22 = vector.shape_cast %21 : vector<128xf32> to vector<1x128xf32>
      %23 = arith.addf %19, %22 : vector<1x128xf32>
      %c0_16 = arith.constant 0 : index
      %c0_17 = arith.constant 0 : index
      %24 = vector.load %arg8[%c0_16, %c0_17] : memref<1x128xf32, #tpu.memory_space<vmem>>, vector<1x128xf32>
      tpu.vector_store %arg8[%c0_16, %c0_17], %23 {strides = array<i32>} : memref<1x128xf32, #tpu.memory_space<vmem>>, vector<1x128xf32>,
    } else {
    }
    %c1_i32 = arith.constant 1 : i32
    %11 = arith.cmpi eq, %arg0, %c1_i32 : i32
    %12 = arith.extui %11 : i1 to i32
    %c0_i32_7 = arith.constant 0 : i32
    %13 = arith.cmpi ne, %12, %c0_i32_7 : i32
    scf.if %13 {
      %c0_8 = arith.constant 0 : index
      %c0_9 = arith.constant 0 : index
      %14 = vector.load %arg7[%c0_8, %c0_9] : memref<1x128xf32, #tpu.memory_space<vmem>>, vector<1x128xf32>
      %cst_10 = arith.constant 7.812500e-03 : f32
      %15 = vector.broadcast %cst_10 : f32 to vector<1x128xf32>
      %16 = arith.mulf %14, %15 : vector<1x128xf32>
      %c0_11 = arith.constant 0 : index
      %c0_12 = arith.constant 0 : index
      %17 = vector.load %arg8[%c0_11, %c0_12] : memref<1x128xf32, #tpu.memory_space<vmem>>, vector<1x128xf32>
      %cst_13 = arith.constant 7.812500e-03 : f32
      %18 = vector.broadcast %cst_13 : f32 to vector<1x128xf32>
      %19 = arith.mulf %17, %18 : vector<1x128xf32>
      %20 = arith.mulf %16, %16 : vector<1x128xf32>
      %21 = arith.subf %19, %20 : vector<1x128xf32>
      %cst_14 = arith.constant 0.000000e+00 : f32
      %22 = vector.broadcast %cst_14 : f32 to vector<1x128xf32>
      %23 = arith.maximumf %21, %22 : vector<1x128xf32>
      %c0_15 = arith.constant 0 : index
      %c0_16 = arith.constant 0 : index
      %24 = vector.load %arg4[%c0_15, %c0_16] : memref<1x128xf32, #tpu.memory_space<vmem>>, vector<1x128xf32>
      %cst_17 = arith.constant 9.99999974E-6 : f32
      %25 = vector.broadcast %cst_17 : f32 to vector<1x128xf32>
      %26 = arith.addf %23, %25 : vector<1x128xf32>
      %27 = math.rsqrt %26 : vector<1x128xf32>
      %28 = arith.mulf %24, %27 : vector<1x128xf32>
      %c0_18 = arith.constant 0 : index
      %c0_19 = arith.constant 0 : index
      %29 = vector.load %arg5[%c0_18, %c0_19] : memref<1x128xf32, #tpu.memory_space<vmem>>, vector<1x128xf32>
      %30 = arith.mulf %16, %28 : vector<1x128xf32>
      %31 = arith.subf %29, %30 : vector<1x128xf32>
      %32 = vector.broadcast %28 : vector<1x128xf32> to vector<128x128xf32>
      %33 = arith.mulf %2, %32 : vector<128x128xf32>
      %34 = vector.broadcast %31 : vector<1x128xf32> to vector<128x128xf32>
      %35 = arith.addf %33, %34 : vector<128x128xf32>
      %cst_20 = arith.constant 0.000000e+00 : f32
      %36 = vector.broadcast %cst_20 : f32 to vector<128x128xf32>
      %37 = arith.cmpf oge, %35, %36 : vector<128x128xf32>
      %cst_21 = arith.constant 2.000000e-01 : f32
      %38 = vector.broadcast %cst_21 : f32 to vector<128x128xf32>
      %39 = arith.mulf %38, %35 : vector<128x128xf32>
      %40 = arith.select %37, %35, %39 : vector<128x128xi1>, vector<128x128xf32>
      %41 = arith.truncf %40 : vector<128x128xf32> to vector<128x128xbf16>
      %c0_22 = arith.constant 0 : index
      %c0_23 = arith.constant 0 : index
      %42 = vector.load %arg6[%c0_22, %c0_23] : memref<128x128xbf16, #tpu.memory_space<vmem>>, vector<128x128xbf16>
      tpu.vector_store %arg6[%c0_22, %c0_23], %41 {strides = array<i32>} : memref<128x128xbf16, #tpu.memory_space<vmem>>, vector<128x128xbf16>,
    } else {
    }
    return
  }
  func.func @transform_0(%arg0: i32, %arg1: i32) -> (i32, i32) {
    %c0_i32 = arith.constant 0 : i32
    %c0_i32_0 = arith.constant 0 : i32
    return %arg1, %c0_i32 : i32, i32
  }
  func.func @transform_1(%arg0: i32, %arg1: i32) -> (i32, i32) {
    %c0_i32 = arith.constant 0 : i32
    %c0_i32_0 = arith.constant 0 : i32
    %c0_i32_1 = arith.constant 0 : i32
    return %c0_i32, %c0_i32_0 : i32, i32
  }
  func.func @transform_2(%arg0: i32, %arg1: i32) -> (i32, i32) {
    %c0_i32 = arith.constant 0 : i32
    %c0_i32_0 = arith.constant 0 : i32
    %c0_i32_1 = arith.constant 0 : i32
    return %c0_i32, %c0_i32_0 : i32, i32
  }
  func.func @transform_3(%arg0: i32, %arg1: i32) -> (i32, i32) {
    %c0_i32 = arith.constant 0 : i32
    %c0_i32_0 = arith.constant 0 : i32
    %c0_i32_1 = arith.constant 0 : i32
    return %c0_i32, %c0_i32_0 : i32, i32
  }
  func.func @transform_4(%arg0: i32, %arg1: i32) -> (i32, i32) {
    %0 = arith.muli %arg1, %arg0 : i32
    %c0_i32 = arith.constant 0 : i32
    %c0_i32_0 = arith.constant 0 : i32
    return %0, %c0_i32 : i32, i32
  }
}

module attributes {stable_mosaic.version = 11 : i64} {
  func.func @_gemm_avgpool_kernel(%arg0: i32, %arg1: memref<1x16x256xbf16, #tpu.memory_space<vmem>>, %arg2: memref<256x128xbf16, #tpu.memory_space<vmem>>, %arg3: memref<1x128xf32, #tpu.memory_space<vmem>>, %arg4: memref<1x1x128xf32, #tpu.memory_space<vmem>>) attributes {dimension_semantics = [#tpu.dimension_semantics<parallel>], iteration_bounds = array<i64: 2>, scalar_prefetch = 0 : i64, scratch_operands = 0 : i64, tpu.core_type = #tpu.core_type<tc>, window_params = [{transform_indices = @transform_0, window_bounds = array<i64: 1, 16, 256>}, {pipeline_mode = #tpu.pipeline_mode<synchronous>, transform_indices = @transform_1, window_bounds = array<i64: 256, 128>}, {pipeline_mode = #tpu.pipeline_mode<synchronous>, transform_indices = @transform_2, window_bounds = array<i64: 1, 128>}, {transform_indices = @transform_3, window_bounds = array<i64: 1, 1, 128>}]} {
    %c0 = arith.constant 0 : index
    %c0_0 = arith.constant 0 : index
    %c0_1 = arith.constant 0 : index
    %0 = vector.load %arg1[%c0, %c0_0, %c0_1] : memref<1x16x256xbf16, #tpu.memory_space<vmem>>, vector<1x16x256xbf16>
    %1 = vector.shape_cast %0 : vector<1x16x256xbf16> to vector<16x256xbf16>
    %2 = arith.extf %1 : vector<16x256xbf16> to vector<16x256xf32>
    %cst = arith.constant dense<0.000000e+00> : vector<256xf32>
    %3 = vector.multi_reduction <add>, %2, %cst [0] : vector<16x256xf32> to vector<256xf32>
    %4 = vector.shape_cast %3 : vector<256xf32> to vector<1x256xf32>
    %cst_2 = arith.constant 6.250000e-02 : f32
    %5 = vector.broadcast %cst_2 : f32 to vector<1x256xf32>
    %6 = arith.mulf %4, %5 : vector<1x256xf32>
    %7 = arith.truncf %6 : vector<1x256xf32> to vector<1x256xbf16>
    %c0_3 = arith.constant 0 : index
    %c0_4 = arith.constant 0 : index
    %8 = vector.load %arg2[%c0_3, %c0_4] : memref<256x128xbf16, #tpu.memory_space<vmem>>, vector<256x128xbf16>
    %cst_5 = arith.constant dense<0.000000e+00> : vector<1x128xf32>
    %9 = tpu.matmul %7, %8, %cst_5 {dimension_numbers = #tpu.dot_dimension_numbers<[1], [0], [0], [1], [0, 0, 1, 1], [], []>} : vector<1x256xbf16>, vector<256x128xbf16>, vector<1x128xf32> -> vector<1x128xf32>
    %c0_6 = arith.constant 0 : index
    %c0_7 = arith.constant 0 : index
    %10 = vector.load %arg3[%c0_6, %c0_7] : memref<1x128xf32, #tpu.memory_space<vmem>>, vector<1x128xf32>
    %11 = arith.addf %9, %10 : vector<1x128xf32>
    %12 = vector.shape_cast %11 : vector<1x128xf32> to vector<1x1x128xf32>
    %c0_8 = arith.constant 0 : index
    %c0_9 = arith.constant 0 : index
    %c0_10 = arith.constant 0 : index
    %13 = vector.load %arg4[%c0_8, %c0_9, %c0_10] : memref<1x1x128xf32, #tpu.memory_space<vmem>>, vector<1x1x128xf32>
    tpu.vector_store %arg4[%c0_8, %c0_9, %c0_10], %12 {strides = array<i32>} : memref<1x1x128xf32, #tpu.memory_space<vmem>>, vector<1x1x128xf32>,
    return
  }
  func.func @transform_0(%arg0: i32) -> (i32, i32, i32) {
    %c0_i32 = arith.constant 0 : i32
    %c0_i32_0 = arith.constant 0 : i32
    %c0_i32_1 = arith.constant 0 : i32
    return %arg0, %c0_i32, %c0_i32_0 : i32, i32, i32
  }
  func.func @transform_1(%arg0: i32) -> (i32, i32) {
    %c0_i32 = arith.constant 0 : i32
    %c0_i32_0 = arith.constant 0 : i32
    %c0_i32_1 = arith.constant 0 : i32
    return %c0_i32, %c0_i32_0 : i32, i32
  }
  func.func @transform_2(%arg0: i32) -> (i32, i32) {
    %c0_i32 = arith.constant 0 : i32
    %c0_i32_0 = arith.constant 0 : i32
    %c0_i32_1 = arith.constant 0 : i32
    return %c0_i32, %c0_i32_0 : i32, i32
  }
  func.func @transform_3(%arg0: i32) -> (i32, i32, i32) {
    %c0_i32 = arith.constant 0 : i32
    %c0_i32_0 = arith.constant 0 : i32
    %c0_i32_1 = arith.constant 0 : i32
    return %arg0, %c0_i32, %c0_i32_0 : i32, i32, i32
  }
}

</mosaic_0001>

<bundles_post_ra>
// kernel: vanilla_encoder_1d_forward.4
= control target key start
LH: loop header
LB: loop body
LE: loop exit
PB: predicated region body
PF: predicated region fallthrough
CT: control target
= control target key end

     0   :  { %s1045_s15 = smov 0   ;;  %s1047_s16 = smov 0   ;;  %s1289_s0 = inlined_call_operand.vmem [shape: bf16[128,128], index: 0, kind: input, shape index: {}]   ;;  %s1290_s1 = inlined_call_operand.vmem [shape: bf16[128,128], index: 1, kind: input, shape index: {}]   ;;  %s1291_s2 = inlined_call_operand.vmem [shape: f32[1,128], index: 2, kind: input, shape index: {}]   ;;  %s1292_s3 = inlined_call_operand.vmem [shape: f32[1,128], index: 3, kind: input, shape index: {}]   ;;  %s1293_s4 = inlined_call_operand.vmem [shape: bf16[128,128], index: 4, kind: output, shape index: {}]  }
   0x1   :  { %s1049_s17 = smov 0  }
   0x2 LB: > { %s26_s18 = sadd.s32 1, %s1013_s16  ;;  %p784_p0 = scmp.ge.s32.totalorder %s1017_s17, 1  ;;  %s1017_s17 = sphi %s1049_s17, %s14_s17   ;;  %s1013_s16 = sphi %s1047_s16, %s1295_s16   ;;  %s1009_s15 = sphi %s1045_s15, %s1294_s15  }
   0x3   : > { %p28_p1 = scmp.ge.s32.totalorder %s26_s18, 2  ;;  %p177_p2 = scmp.lt.s32.totalorder %s1017_s17, 3 }
   0x5   : > { %s1297_s18 = smov (%p28_p1, %s26_s18), 0  ;;  %p178_p3 = pnand %p784_p0, %p177_p2 }
   0x6   : > { %v977_v0 = vld [vmem:[%s1290_s1] sm:$0xff] (!%p178_p3)   ;;  %v978_v1 = vld [vmem:[%s1290_s1 + $0x8] sm:$0xff] (!%p178_p3)   ;;  %v979_v2 = vld [vmem:[%s1290_s1 + $0x10] sm:$0xff] (!%p178_p3)   ;;  %p444_p4 = scmp.eq.s32.totalorder (!%p178_p3), %s1009_s15, 0 }
   0x7   : > { %181 = sbr.rel (%p178_p3) target bundleno = 369 (0x171), region = 36  ;;  %904 = vmatprep.subr.bf16.mxu0 (!%p178_p3), %v977_v0  ;;  %936 = vmatprep.subr.bf16.mxu1 (!%p178_p3), %v977_v0  ;;  %v980_v3 = vld [vmem:[%s1290_s1 + $0x18] sm:$0xff] (!%p178_p3)   ;;  %v985_v4 = vld [vmem:[%s1289_s0] sm:$0xff] (!%p178_p3)   ;;  %v982_v7 = vld [vmem:[%s1290_s1 + $0x28] sm:$0xff] (!%p178_p3)  }
   0x8   : > { %905 = vmatpush3.bf16.msra.mxu0 (!%p178_p3), %v977_v0  ;;  %944 = vmatpush3.bf16.msra.mxu1 (!%p178_p3), %v977_v0  ;;  %v986_v5 = vld [vmem:[%s1289_s0 + $0x20] sm:$0xff] (!%p178_p3)   ;;  %v983_v8 = vld [vmem:[%s1290_s1 + $0x30] sm:$0xff] (!%p178_p3)   ;;  %v984_v9 = vld [vmem:[%s1290_s1 + $0x38] sm:$0xff] (!%p178_p3)  }
   0x9   : > { %906 = vmatprep.subr.bf16.mxu0 (!%p178_p3), %v978_v1  ;;  %937 = vmatprep.subr.bf16.mxu1 (!%p178_p3), %v978_v1  ;;  %v981_v6 = vld [vmem:[%s1290_s1 + $0x20] sm:$0xff] (!%p178_p3)   ;;  %v987_v10 = vld [vmem:[%s1289_s0 + $0x8] sm:$0xff] (!%p178_p3)   ;;  %v989_v12 = vld [vmem:[%s1289_s0 + $0x10] sm:$0xff] (!%p178_p3)  }
   0xa   : > { %920 = vmatprep.mubr.bf16.mxu0 (!%p178_p3), %v985_v4  ;;  %928 = vmatprep.mubr.bf16.mxu1 (!%p178_p3), %v986_v5  ;;  %v988_v11 = vld [vmem:[%s1289_s0 + $0x28] sm:$0xff] (!%p178_p3)   ;;  %v990_v13 = vld [vmem:[%s1289_s0 + $0x30] sm:$0xff] (!%p178_p3)   ;;  %v991_v14 = vld [vmem:[%s1289_s0 + $0x18] sm:$0xff] (!%p178_p3)  }
   0xb   : > { %v992_v15 = vld [vmem:[%s1289_s0 + $0x38] sm:$0xff] (!%p178_p3)  }
   0xc   : > { %907 = vmatpush3.bf16.msra.mxu0 (!%p178_p3), %v978_v1  ;;  %945 = vmatpush3.bf16.msra.mxu1 (!%p178_p3), %v978_v1 }
   0xd   : > { %908 = vmatprep.subr.bf16.mxu0 (!%p178_p3), %v979_v2  ;;  %938 = vmatprep.subr.bf16.mxu1 (!%p178_p3), %v979_v2 }
   0xe   : > { %v1019_v32 = vmov (%p444_p4), 0.0  }
   0xf   : > { %450 = vst [vmem:[#allocation2] sm:$0x1] (%p444_p4), %v1019_v32  ;;  %451 = vst [vmem:[#allocation3] sm:$0x1] (%p444_p4), %v1019_v32 }
  0x10   : > { %909 = vmatpush3.bf16.msra.mxu0 %v979_v2  ;;  %946 = vmatpush3.bf16.msra.mxu1 %v979_v2 }
  0x11   : > { %910 = vmatprep.subr.bf16.mxu0 %v980_v3  ;;  %939 = vmatprep.subr.bf16.mxu1 %v980_v3 }
  0x14   : > { %911 = vmatpush3.bf16.msra.mxu0 %v980_v3  ;;  %947 = vmatpush3.bf16.msra.mxu1 %v980_v3 }
  0x15   : > { %912 = vmatprep.subr.bf16.mxu0 %v981_v6  ;;  %940 = vmatprep.subr.bf16.mxu1 %v981_v6 }
  0x18   : > { %913 = vmatpush3.bf16.msra.mxu0 %v981_v6  ;;  %948 = vmatpush3.bf16.msra.mxu1 %v981_v6 }
  0x19   : > { %914 = vmatprep.subr.bf16.mxu0 %v982_v7  ;;  %941 = vmatprep.subr.bf16.mxu1 %v982_v7 }
  0x1c   : > { %915 = vmatpush3.bf16.msra.mxu0 %v982_v7  ;;  %949 = vmatpush3.bf16.msra.mxu1 %v982_v7 }
  0x1d   : > { %916 = vmatprep.subr.bf16.mxu0 %v983_v8  ;;  %942 = vmatprep.subr.bf16.mxu1 %v983_v8 }
  0x20   : > { %917 = vmatpush3.bf16.msra.mxu0 %v983_v8  ;;  %950 = vmatpush3.bf16.msra.mxu1 %v983_v8 }
  0x21   : > { %918 = vmatprep.subr.bf16.mxu0 %v984_v9  ;;  %943 = vmatprep.subr.bf16.mxu1 %v984_v9 }
  0x24   : > { %919 = vmatpush3.bf16.msra.mxu0 %v984_v9  ;;  %951 = vmatpush3.bf16.msra.mxu1 %v984_v9 }
  0x27   : > { %921 = vmatmul.mubr.bf16.vlgmr.msra.gmra.mrb[0].mxu0 %v987_v10  ;;  %929 = vmatmul.mubr.bf16.vlgmr.msra.gmra.mrb[0].mxu1 %v988_v11 }
  0x28   : > { %924 = vmatprep.mubr.bf16.mxu0 %v989_v12  ;;  %932 = vmatprep.mubr.bf16.mxu1 %v990_v13 }
  0x2f   : > { %925 = vmatmul.mubr.bf16.gmra.mrb[4].mxu0 %v991_v14  ;;  %933 = vmatmul.mubr.bf16.gmra.mrb[4].mxu1 %v992_v15 }
  0xfa   : > { %v1114_v16 = vpop.f32.mrb[0].mxu0  ;;  %v1116_v17 = vpop.f32.mrb[0].mxu1 }
  0xfb   : > { %v1118_v18 = vpop.f32.mrb[1].mxu0  ;;  %v1120_v19 = vpop.f32.mrb[1].mxu1 }
  0xfc   : > { %v1122_v20 = vpop.f32.mrb[2].mxu0  ;;  %v1124_v21 = vpop.f32.mrb[2].mxu1 }
  0xfd   : > { %v1126_v22 = vpop.f32.mrb[3].mxu0  ;;  %v1128_v23 = vpop.f32.mrb[3].mxu1 }
  0xff   : > { %449 = sbr.rel (!%p444_p4) target bundleno = 262 (0x106), region = 40 }
 0x102   : > { %v1130_v24 = vpop.f32.mrb[4].mxu0  ;;  %v1132_v25 = vpop.f32.mrb[4].mxu1 }
 0x103   : > { %v1134_v26 = vpop.f32.mrb[5].mxu0  ;;  %v1136_v27 = vpop.f32.mrb[5].mxu1 }
 0x104   : > { %v1138_v28 = vpop.f32.mrb[6].mxu0  ;;  %v1140_v29 = vpop.f32.mrb[6].mxu1 }
 0x105   : > { %v1142_v30 = vpop.f32.mrb[7].mxu0  ;;  %v1144_v31 = vpop.f32.mrb[7].mxu1 }
 0x106 PF: > { %p802_p5 = scmp.ne.s32.totalorder %s1009_s15, 0 }
 0x107   : > { %v456_v33 = vadd.f32 (!%p802_p5), %v1126_v22, %v1118_v18  ;;  %v480_v34 = vmul.f32 (!%p802_p5), %v1118_v18, %v1118_v18  ;;  %v481_v35 = vmul.f32 (!%p802_p5), %v1126_v22, %v1126_v22  ;;  %v482_v37 = vmul.f32 (!%p802_p5), %v1114_v16, %v1114_v16 }
 0x108   : > { %454 = sbr.rel (%p802_p5) target bundleno = 310 (0x136), region = 44  ;;  %v483_v39 = vmul.f32 (!%p802_p5), %v1122_v20, %v1122_v20  ;;  %v484_v42 = vmul.f32 (!%p802_p5), %v1134_v26, %v1134_v26  ;;  %v485_v45 = vmul.f32 (!%p802_p5), %v1142_v30, %v1142_v30  ;;  %v486_v48 = vmul.f32 (!%p802_p5), %v1130_v24, %v1130_v24 }
 0x109   : > { %v457_v36 = vadd.f32 (!%p802_p5), %v1114_v16, %v456_v33  ;;  %v496_v40 = vadd.f32 (!%p802_p5), %v481_v35, %v480_v34  ;;  %v487_v51 = vmul.f32 (!%p802_p5), %v1138_v28, %v1138_v28  ;;  %v488_v54 = vmul.f32 (!%p802_p5), %v1120_v19, %v1120_v19 }
 0x10a   : > { %v489_v57 = vmul.f32 (!%p802_p5), %v1128_v23, %v1128_v23  ;;  %v490_v60 = vmul.f32 (!%p802_p5), %v1116_v17, %v1116_v17  ;;  %v491_v63 = vmul.f32 (!%p802_p5), %v1124_v21, %v1124_v21  ;;  %v492_v2 = vmul.f32 (!%p802_p5), %v1136_v27, %v1136_v27 }
 0x10b   : > { %v458_v38 = vadd.f32 (!%p802_p5), %v1122_v20, %v457_v36  ;;  %v497_v43 = vadd.f32 (!%p802_p5), %v496_v40, %v482_v37  ;;  %v493_v5 = vmul.f32 (!%p802_p5), %v1144_v31, %v1144_v31  ;;  %v494_v8 = vmul.f32 (!%p802_p5), %v1132_v25, %v1132_v25 }
 0x10c   : > { %v495_v11 = vmul.f32 (!%p802_p5), %v1140_v29, %v1140_v29 }
 0x10d   : > { %v459_v41 = vadd.f32 (!%p802_p5), %v458_v38, %v1134_v26  ;;  %v498_v46 = vadd.f32 (!%p802_p5), %v497_v43, %v483_v39  ;;  %v455_v39 = vld [vmem:[#allocation2] sm:$0x1] (!%p802_p5) }
 0x10f   : > { %v460_v44 = vadd.f32 %v459_v41, %v1142_v30  ;;  %v499_v49 = vadd.f32 %v498_v46, %v484_v42 }
 0x111   : > { %v461_v47 = vadd.f32 %v1130_v24, %v460_v44  ;;  %v500_v52 = vadd.f32 %v499_v49, %v485_v45  ;;  %v479_v44 = vld [vmem:[#allocation3] sm:$0x1] }
 0x113   : > { %v462_v50 = vadd.f32 %v1138_v28, %v461_v47  ;;  %v501_v55 = vadd.f32 %v500_v52, %v486_v48 }
 0x115   : > { %v463_v53 = vadd.f32 %v462_v50, %v1120_v19  ;;  %v502_v58 = vadd.f32 %v501_v55, %v487_v51 }
 0x117   : > { %v464_v56 = vadd.f32 %v463_v53, %v1128_v23  ;;  %v503_v61 = vadd.f32 %v502_v58, %v488_v54 }
 0x119   : > { %v465_v59 = vadd.f32 %v1116_v17, %v464_v56  ;;  %v504_v0 = vadd.f32 %v503_v61, %v489_v57 }
 0x11b   : > { %v466_v62 = vadd.f32 %v1124_v21, %v465_v59  ;;  %v505_v3 = vadd.f32 %v504_v0, %v490_v60 }
 0x11d   : > { %v467_v1 = vadd.f32 %v466_v62, %v1136_v27  ;;  %v506_v6 = vadd.f32 %v505_v3, %v491_v63 }
 0x11f   : > { %v468_v4 = vadd.f32 %v467_v1, %v1144_v31  ;;  %v507_v9 = vadd.f32 %v506_v6, %v492_v2 }
 0x121   : > { %v469_v7 = vadd.f32 %v1132_v25, %v468_v4  ;;  %v508_v12 = vadd.f32 %v507_v9, %v493_v5 }
 0x123   : > { %v470_v10 = vadd.f32 %v1140_v29, %v469_v7  ;;  %v509_v14 = vadd.f32 %v508_v12, %v494_v8 }
 0x125   : > { %v471_v13 = vrot.slane %v470_v10, 4  ;;  %v510_v32 = vadd.f32 %v509_v14, %v495_v11 }
 0x127   : > { %v472_v15 = vadd.f32 %v471_v13, %v470_v10  ;;  %v511_v34 = vrot.slane %v510_v32, 4 }
 0x129   : > { %v473_v33 = vrot.slane %v472_v15, 2  ;;  %v512_v36 = vadd.f32 %v511_v34, %v510_v32 }
 0x12b   : > { %v474_v35 = vadd.f32 %v473_v33, %v472_v15  ;;  %v513_v38 = vrot.slane %v512_v36, 2 }
 0x12d   : > { %v475_v37 = vrot.slane %v474_v35, 1  ;;  %v514_v41 = vadd.f32 %v513_v38, %v512_v36 }
 0x12f   : > { %v476_v40 = vadd.f32 %v475_v37, %v474_v35  ;;  %v515_v43 = vrot.slane %v514_v41, 1 }
 0x131   : > { %v477_v42 = vadd.f32 %v476_v40, %v455_v39  ;;  %v516_v45 = vadd.f32 %v515_v43, %v514_v41 }
 0x133   : > { %478 = vst [vmem:[#allocation2] sm:$0x1] %v477_v42  ;;  %v517_v46 = vadd.f32 %v516_v45, %v479_v44 }
 0x135   : > { %518 = vst [vmem:[#allocation3] sm:$0x1] %v517_v46 }
 0x136 PF: > { %p803_p6 = scmp.ne.s32.totalorder %s1009_s15, 1 }
 0x137   : > { %v538_v55 = vlaneseq (!%p803_p6)  ;;  %v530_v57 = vld [vmem:[%s1291_s2] sm:$0x1] (!%p803_p6) }
 0x138   : > { %522 = sbr.rel (%p803_p6) target bundleno = 369 (0x171), region = 48  ;;  %v534_v61 = vld [vmem:[%s1292_s3] sm:$0x1] (!%p803_p6) }
 0x139   : > { %v539_v56 = vshrl.u32 (!%p803_p6), %v538_v55, 7 }
 0x13a   : > { %v523_v47 = vld [vmem:[#allocation2] sm:$0x1] (!%p803_p6) }
 0x13b   : > { %v524_v49 = vmul.f32 (!%p803_p6), 0.0078125, %v523_v47  ;;  %v540_v58 = vsub.s32 (!%p803_p6), 0, %v539_v56 }
 0x13c   : > { %v525_v48 = vld [vmem:[#allocation3] sm:$0x1] (!%p803_p6) }
 0x13d   : > { %v526_v50 = vmul.f32 (!%p803_p6), 0.0078125, %v525_v48  ;;  %v527_v51 = vmul.f32 (!%p803_p6), %v524_v49, %v524_v49 }
 0x13f   : > { %v528_v52 = vsub.f32 %v526_v50, %v527_v51 }
 0x141   : > { %v529_v53 = vmax.f32 %v528_v52, 0.0 }
 0x143   : > { %v531_v54 = vadd.f32 1e-05, %v529_v53 }
 0x145   : > { %993 = vrsqrt.f32 %v531_v54 }
 0x14f   : > { %v994_v59 = vpop.eup %993 }
 0x150   : > { %v533_v60 = vmul.f32 %v994_v59, %v530_v57 }
 0x152   : > { %v535_v62 = vmul.f32 %v533_v60, %v524_v49  ;;  %v1204_v63 = vrot.slane %v533_v60, %v540_v58 }
 0x154   : > { %v536_v0 = vsub.f32 %v534_v61, %v535_v62  ;;  %v543_v1 = vmul.f32 %v1204_v63, %v1118_v18  ;;  %v544_v2 = vmul.f32 %v1204_v63, %v1126_v22  ;;  %v545_v3 = vmul.f32 %v1114_v16, %v1204_v63 }
 0x155   : > { %v546_v4 = vmul.f32 %v1122_v20, %v1204_v63  ;;  %v547_v5 = vmul.f32 %v1204_v63, %v1134_v26  ;;  %v548_v6 = vmul.f32 %v1204_v63, %v1142_v30  ;;  %v549_v7 = vmul.f32 %v1130_v24, %v1204_v63 }
 0x156   : > { %v1220_v8 = vrot.slane %v536_v0, %v540_v58  ;;  %v550_v18 = vmul.f32 %v1138_v28, %v1204_v63  ;;  %v551_v16 = vmul.f32 %v1204_v63, %v1120_v19  ;;  %v552_v20 = vmul.f32 %v1204_v63, %v1128_v23 }
 0x157   : > { %v553_v22 = vmul.f32 %v1116_v17, %v1204_v63  ;;  %v554_v26 = vmul.f32 %v1124_v21, %v1204_v63  ;;  %v555_v24 = vmul.f32 %v1204_v63, %v1136_v27  ;;  %v556_v30 = vmul.f32 %v1204_v63, %v1144_v31 }
 0x158   : > { %v565_v28 = vadd.f32 %v1220_v8, %v543_v1  ;;  %v566_v9 = vadd.f32 %v1220_v8, %v544_v2  ;;  %v567_v19 = vadd.f32 %v1220_v8, %v545_v3  ;;  %v568_v23 = vadd.f32 %v1220_v8, %v546_v4 }
 0x159   : > { %v569_v10 = vadd.f32 %v1220_v8, %v547_v5  ;;  %v570_v17 = vadd.f32 %v1220_v8, %v548_v6  ;;  %v571_v21 = vadd.f32 %v1220_v8, %v549_v7  ;;  %v572_v11 = vadd.f32 %v1220_v8, %v550_v18 }
 0x15a   : > { %vm581_vm0 = vcmp.ge.f32.partialorder %v565_v28, 0.0  ;;  %vm582_vm1 = vcmp.ge.f32.partialorder %v566_v9, 0.0  ;;  %v597_v27 = vmul.f32 0.2, %v565_v28  ;;  %v598_v31 = vmul.f32 0.2, %v566_v9 }
 0x15b   : > { %vm583_vm2 = vcmp.ge.f32.partialorder %v567_v19, 0.0  ;;  %vm584_vm3 = vcmp.ge.f32.partialorder %v568_v23, 0.0  ;;  %v599_v12 = vmul.f32 0.2, %v567_v19  ;;  %v600_v13 = vmul.f32 0.2, %v568_v23 }
 0x15c   : > { %v613_v14 = vsel %vm581_vm0, %v565_v28, %v597_v27  ;;  %v614_v15 = vsel %vm582_vm1, %v566_v9, %v598_v31  ;;  %vm585_vm4 = vcmp.ge.f32.partialorder %v569_v10, 0.0  ;;  %vm586_vm5 = vcmp.ge.f32.partialorder %v570_v17, 0.0 }
 0x15d   : > { %v844_v32 = vpack.c.bf16 %v614_v15, %v613_v14  ;;  %v615_v33 = vsel %vm583_vm2, %v567_v19, %v599_v12  ;;  %v616_v34 = vsel %vm584_vm3, %v568_v23, %v600_v13  ;;  %v601_v35 = vmul.f32 0.2, %v569_v10 }
 0x15e   : > { %v849_v36 = vpack.c.bf16 %v616_v34, %v615_v33  ;;  %v602_v37 = vmul.f32 0.2, %v570_v17  ;;  %vm587_vm6 = vcmp.ge.f32.partialorder %v571_v21, 0.0  ;;  %vm588_vm7 = vcmp.ge.f32.partialorder %v572_v11, 0.0 }
 0x15f   : > { %845 = vst [vmem:[%s1293_s4] sm:$0xff] %v844_v32   ;;  %v617_v38 = vsel %vm585_vm4, %v569_v10, %v601_v35  ;;  %v603_v39 = vmul.f32 0.2, %v571_v21  ;;  %v604_v40 = vmul.f32 0.2, %v572_v11  ;;  %v573_v41 = vadd.f32 %v1220_v8, %v551_v16 }
 0x160   : > { %881 = vst [vmem:[%s1293_s4 + $0x8] sm:$0xff] %v849_v36   ;;  %v618_v42 = vsel %vm586_vm5, %v570_v17, %v602_v37  ;;  %v574_v43 = vadd.f32 %v1220_v8, %v552_v20  ;;  %v575_v44 = vadd.f32 %v1220_v8, %v553_v22  ;;  %v576_v45 = vadd.f32 %v1220_v8, %v554_v26 }
 0x161   : > { %v854_v46 = vpack.c.bf16 %v618_v42, %v617_v38  ;;  %v619_v47 = vsel %vm587_vm6, %v571_v21, %v603_v39  ;;  %v620_v48 = vsel %vm588_vm7, %v572_v11, %v604_v40  ;;  %vm589_vm8 = vcmp.ge.f32.partialorder %v573_v41, 0.0 }
 0x162   : > { %v859_v49 = vpack.c.bf16 %v620_v48, %v619_v47  ;;  %vm590_vm9 = vcmp.ge.f32.partialorder %v574_v43, 0.0  ;;  %v605_v50 = vmul.f32 0.2, %v573_v41  ;;  %v606_v51 = vmul.f32 0.2, %v574_v43 }
 0x163   : > { %882 = vst [vmem:[%s1293_s4 + $0x10] sm:$0xff] %v854_v46   ;;  %vm591_vm10 = vcmp.ge.f32.partialorder %v575_v44, 0.0  ;;  %vm592_vm11 = vcmp.ge.f32.partialorder %v576_v45, 0.0  ;;  %v607_v52 = vmul.f32 0.2, %v575_v44  ;;  %v577_v56 = vadd.f32 %v1220_v8, %v555_v24 }
 0x164   : > { %v608_v53 = vmul.f32 0.2, %v576_v45  ;;  %883 = vst [vmem:[%s1293_s4 + $0x18] sm:$0xff] %v859_v49   ;;  %v621_v54 = vsel %vm589_vm8, %v573_v41, %v605_v50  ;;  %v622_v55 = vsel %vm590_vm9, %v574_v43, %v606_v51  ;;  %v578_v57 = vadd.f32 %v1220_v8, %v556_v30 }
 0x165   : > { %v864_v58 = vpack.c.bf16 %v622_v55, %v621_v54  ;;  %v623_v59 = vsel %vm591_vm10, %v575_v44, %v607_v52  ;;  %v557_v61 = vmul.f32 %v1132_v25, %v1204_v63  ;;  %vm593_vm12 = vcmp.ge.f32.partialorder %v577_v56, 0.0 }
 0x166   : > { %v624_v60 = vsel %vm592_vm11, %v576_v45, %v608_v53  ;;  %vm594_vm13 = vcmp.ge.f32.partialorder %v578_v57, 0.0  ;;  %v609_v0 = vmul.f32 0.2, %v577_v56  ;;  %v610_v1 = vmul.f32 0.2, %v578_v57 }
 0x167   : > { %v869_v62 = vpack.c.bf16 %v624_v60, %v623_v59  ;;  %884 = vst [vmem:[%s1293_s4 + $0x20] sm:$0xff] %v864_v58   ;;  %v558_v2 = vmul.f32 %v1140_v29, %v1204_v63  ;;  %v579_v3 = vadd.f32 %v1220_v8, %v557_v61 }
 0x168   : > { %v625_v4 = vsel %vm593_vm12, %v577_v56, %v609_v0  ;;  %v626_v25 = vsel %vm594_vm13, %v578_v57, %v610_v1 }
 0x169   : > { %885 = vst [vmem:[%s1293_s4 + $0x28] sm:$0xff] %v869_v62   ;;  %v580_v5 = vadd.f32 %v1220_v8, %v558_v2  ;;  %vm595_vm14 = vcmp.ge.f32.partialorder %v579_v3, 0.0  ;;  %v611_v6 = vmul.f32 0.2, %v579_v3  ;;  %v874_v7 = vpack.c.bf16 %v626_v25, %v625_v4 }
 0x16b   : > { %vm596_vm15 = vcmp.ge.f32.partialorder %v580_v5, 0.0  ;;  %v612_v18 = vmul.f32 0.2, %v580_v5  ;;  %v627_v16 = vsel %vm595_vm14, %v579_v3, %v611_v6  ;;  %886 = vst [vmem:[%s1293_s4 + $0x30] sm:$0xff] %v874_v7  }
 0x16d   : > { %v628_v29 = vsel %vm596_vm15, %v580_v5, %v612_v18 }
 0x16e   : > { %v879_v63 = vpack.c.bf16 %v628_v29, %v627_v16 }
 0x170   : > { %887 = vst [vmem:[%s1293_s4 + $0x38] sm:$0xff] %v879_v63  }
 0x171 PF: > { %s14_s17 = sadd.s32 1, %s1017_s17   ;;  %s1294_s15 = smov %s1013_s16 }
 0x172   : > { %p11_p7 = scmp.ge.s32.totalorder %s14_s17, 4   ;;  %s1295_s16 = smov %s1297_s18 }
 0x174   :  { %13 = sbr.rel (!%p11_p7) target bundleno = 2 (0x2), region = 78 }

// kernel: vanilla_encoder_1d_forward.3
= control target key start
LH: loop header
LB: loop body
LE: loop exit
PB: predicated region body
PF: predicated region fallthrough
CT: control target
= control target key end

     0   :  { %s2618_s15 = smov 0   ;;  %s2620_s16 = smov 0   ;;  %s3542_s0 = inlined_call_operand.vmem [shape: bf16[512,256], index: 0, kind: input, shape index: {}]   ;;  %s3543_s1 = inlined_call_operand.vmem [shape: bf16[256,128], index: 1, kind: input, shape index: {}]   ;;  %s3544_s2 = inlined_call_operand.vmem [shape: f32[1,128], index: 2, kind: input, shape index: {}]   ;;  %s3545_s3 = inlined_call_operand.vmem [shape: f32[1,128], index: 3, kind: input, shape index: {}]   ;;  %s3546_s4 = inlined_call_operand.vmem [shape: bf16[512,128], index: 4, kind: output, shape index: {}]  }
   0x1   :  { %s2622_s17 = smov 0  }
   0x2 LB: > { %s26_s18 = sadd.s32 1, %s2585_s16  ;;  %p1987_p0 = scmp.ge.s32.totalorder %s2589_s17, 1  ;;  %s2589_s17 = sphi %s2622_s17, %s14_s17   ;;  %s2585_s16 = sphi %s2620_s16, %s3638_s16   ;;  %s2581_s15 = sphi %s2618_s15, %s3637_s15  }
   0x3   : > { %p28_p1 = scmp.ge.s32.totalorder %s26_s18, 2  ;;  %p178_p2 = scmp.lt.s32.totalorder %s2589_s17, 3 }
   0x5   : > { %s3640_s18 = smov (%p28_p1, %s26_s18), 0  ;;  %p179_p3 = pnand %p1987_p0, %p178_p2 }
   0x7   : > { %182 = sbr.rel (%p179_p3) target bundleno = 693 (0x2b5), region = 36 }
   0xe   : > { %v2453_v0 = vld [vmem:[%s3543_s1] sm:$0xff]   ;;  %v2591_v1 = vmov 0   ;;  %v2454_v2 = vld [vmem:[%s3543_s1 + $0x8] sm:$0xff]   ;;  %v2455_v3 = vld [vmem:[%s3543_s1 + $0x10] sm:$0xff]   ;;  %p1023_p4 = scmp.eq.s32.totalorder %s2581_s15, 0 }
   0xf   : > { %734 = vmatprep.subr.bf16.mxu0 %v2591_v1  ;;  %2395 = vmatprep.subr.bf16.mxu1 %v2591_v1  ;;  %v2456_v4 = vld [vmem:[%s3543_s1 + $0x18] sm:$0xff]   ;;  %v2457_v5 = vld [vmem:[%s3543_s1 + $0x20] sm:$0xff]   ;;  %v2458_v7 = vld [vmem:[%s3543_s1 + $0x28] sm:$0xff]  }
  0x10   : > { %735 = vmatpush1.bf16.msra.mxu0 %v2453_v0  ;;  %2411 = vmatpush1.bf16.msra.mxu1 %v2453_v0  ;;  %v2471_v6 = vld [vmem:[%s3542_s0 + $0x4] ss:$8 sps:$4 sm:$0xff]   ;;  %v2459_v9 = vld [vmem:[%s3543_s1 + $0x30] sm:$0xff]   ;;  %v2460_v10 = vld [vmem:[%s3543_s1 + $0x38] sm:$0xff]  }
  0x11   : > { %736 = vmatprep.subr.bf16.mxu0 %v2591_v1  ;;  %2396 = vmatprep.subr.bf16.mxu1 %v2591_v1  ;;  %v2474_v8 = vld [vmem:[%s3542_s0 + $0x104] ss:$8 sps:$4 sm:$0xff]   ;;  %v2463_v13 = vld [vmem:[%s3543_s1 + $0x50] sm:$0xff]   ;;  %v2464_v14 = vld [vmem:[%s3543_s1 + $0x58] sm:$0xff]  }
  0x12   : > { %766 = vmatprep.mubr.bf16.mxu0 %v2471_v6  ;;  %894 = vmatprep.mubr.bf16.mxu1 %v2474_v8  ;;  %v2461_v11 = vld [vmem:[%s3543_s1 + $0x40] sm:$0xff]   ;;  %v2462_v12 = vld [vmem:[%s3543_s1 + $0x48] sm:$0xff]   ;;  %v2467_v17 = vld [vmem:[%s3543_s1 + $0x70] sm:$0xff]  }
  0x13   : > { %v2465_v15 = vld [vmem:[%s3543_s1 + $0x60] sm:$0xff]   ;;  %v2466_v16 = vld [vmem:[%s3543_s1 + $0x68] sm:$0xff]   ;;  %v2468_v18 = vld [vmem:[%s3543_s1 + $0x78] sm:$0xff]  }
  0x14   : > { %737 = vmatpush1.bf16.msra.mxu0 %v2454_v2  ;;  %2412 = vmatpush1.bf16.msra.mxu1 %v2454_v2  ;;  %v2469_v19 = vld [vmem:[%s3542_s0] ss:$8 sps:$4 sm:$0xff]   ;;  %v2475_v21 = vld [vmem:[%s3542_s0 + $0x14] ss:$8 sps:$4 sm:$0xff]   ;;  %v2479_v23 = vld [vmem:[%s3542_s0 + $0x10] ss:$8 sps:$4 sm:$0xff]  }
  0x15   : > { %738 = vmatprep.subr.bf16.mxu0 %v2591_v1  ;;  %2397 = vmatprep.subr.bf16.mxu1 %v2591_v1  ;;  %v2472_v20 = vld [vmem:[%s3542_s0 + $0x100] ss:$8 sps:$4 sm:$0xff]   ;;  %v2477_v22 = vld [vmem:[%s3542_s0 + $0x114] ss:$8 sps:$4 sm:$0xff]   ;;  %v2480_v24 = vld [vmem:[%s3542_s0 + $0x110] ss:$8 sps:$4 sm:$0xff]  }
  0x16   : > { %v2481_v25 = vld [vmem:[%s3542_s0 + $0x24] ss:$8 sps:$4 sm:$0xff]   ;;  %v2485_v27 = vld [vmem:[%s3542_s0 + $0x20] ss:$8 sps:$4 sm:$0xff]   ;;  %v2487_v29 = vld [vmem:[%s3542_s0 + $0x34] ss:$8 sps:$4 sm:$0xff]  }
  0x17   : > { %v2483_v26 = vld [vmem:[%s3542_s0 + $0x124] ss:$8 sps:$4 sm:$0xff]   ;;  %v2486_v28 = vld [vmem:[%s3542_s0 + $0x120] ss:$8 sps:$4 sm:$0xff]   ;;  %v2489_v30 = vld [vmem:[%s3542_s0 + $0x134] ss:$8 sps:$4 sm:$0xff]  }
  0x18   : > { %739 = vmatpush1.bf16.msra.mxu0 %v2455_v3  ;;  %2413 = vmatpush1.bf16.msra.mxu1 %v2455_v3  ;;  %v2491_v31 = vld [vmem:[%s3542_s0 + $0x30] ss:$8 sps:$4 sm:$0xff]   ;;  %v2493_v33 = vld [vmem:[%s3542_s0 + $0x44] ss:$8 sps:$4 sm:$0xff]   ;;  %v2497_v35 = vld [vmem:[%s3542_s0 + $0x40] ss:$8 sps:$4 sm:$0xff]  }
  0x19   : > { %740 = vmatprep.subr.bf16.mxu0 %v2591_v1  ;;  %2398 = vmatprep.subr.bf16.mxu1 %v2591_v1  ;;  %v2492_v32 = vld [vmem:[%s3542_s0 + $0x130] ss:$8 sps:$4 sm:$0xff]   ;;  %v2495_v34 = vld [vmem:[%s3542_s0 + $0x144] ss:$8 sps:$4 sm:$0xff]   ;;  %v2498_v36 = vld [vmem:[%s3542_s0 + $0x140] ss:$8 sps:$4 sm:$0xff]  }
  0x1a   : > { %v2499_v37 = vld [vmem:[%s3542_s0 + $0x54] ss:$8 sps:$4 sm:$0xff]   ;;  %v2503_v39 = vld [vmem:[%s3542_s0 + $0x50] ss:$8 sps:$4 sm:$0xff]   ;;  %v2505_v41 = vld [vmem:[%s3542_s0 + $0x64] ss:$8 sps:$4 sm:$0xff]  }
  0x1b   : > { %v2501_v38 = vld [vmem:[%s3542_s0 + $0x154] ss:$8 sps:$4 sm:$0xff]   ;;  %v2504_v40 = vld [vmem:[%s3542_s0 + $0x150] ss:$8 sps:$4 sm:$0xff]   ;;  %v2507_v42 = vld [vmem:[%s3542_s0 + $0x164] ss:$8 sps:$4 sm:$0xff]  }
  0x1c   : > { %741 = vmatpush1.bf16.msra.mxu0 %v2456_v4  ;;  %2414 = vmatpush1.bf16.msra.mxu1 %v2456_v4  ;;  %v2509_v43 = vld [vmem:[%s3542_s0 + $0x60] ss:$8 sps:$4 sm:$0xff]   ;;  %v2511_v45 = vld [vmem:[%s3542_s0 + $0x74] ss:$8 sps:$4 sm:$0xff]   ;;  %v2515_v47 = vld [vmem:[%s3542_s0 + $0x70] ss:$8 sps:$4 sm:$0xff]  }
  0x1d   : > { %742 = vmatprep.subr.bf16.mxu0 %v2591_v1  ;;  %2399 = vmatprep.subr.bf16.mxu1 %v2591_v1  ;;  %v2510_v44 = vld [vmem:[%s3542_s0 + $0x160] ss:$8 sps:$4 sm:$0xff]   ;;  %v2513_v46 = vld [vmem:[%s3542_s0 + $0x174] ss:$8 sps:$4 sm:$0xff]   ;;  %v2516_v48 = vld [vmem:[%s3542_s0 + $0x170] ss:$8 sps:$4 sm:$0xff]  }
  0x1e   : > { %v2517_v49 = vld [vmem:[%s3542_s0 + $0x84] ss:$8 sps:$4 sm:$0xff]   ;;  %v2521_v51 = vld [vmem:[%s3542_s0 + $0x80] ss:$8 sps:$4 sm:$0xff]   ;;  %v2523_v53 = vld [vmem:[%s3542_s0 + $0x94] ss:$8 sps:$4 sm:$0xff]  }
  0x1f   : > { %v2519_v50 = vld [vmem:[%s3542_s0 + $0x184] ss:$8 sps:$4 sm:$0xff]   ;;  %v2522_v52 = vld [vmem:[%s3542_s0 + $0x180] ss:$8 sps:$4 sm:$0xff]   ;;  %v2525_v54 = vld [vmem:[%s3542_s0 + $0x194] ss:$8 sps:$4 sm:$0xff]  }
  0x20   : > { %743 = vmatpush1.bf16.msra.mxu0 %v2457_v5  ;;  %2415 = vmatpush1.bf16.msra.mxu1 %v2457_v5  ;;  %v2527_v55 = vld [vmem:[%s3542_s0 + $0x90] ss:$8 sps:$4 sm:$0xff]   ;;  %v2529_v57 = vld [vmem:[%s3542_s0 + $0xa4] ss:$8 sps:$4 sm:$0xff]   ;;  %v2533_v59 = vld [vmem:[%s3542_s0 + $0xa0] ss:$8 sps:$4 sm:$0xff]  }
  0x21   : > { %744 = vmatprep.subr.bf16.mxu0 %v2591_v1  ;;  %2400 = vmatprep.subr.bf16.mxu1 %v2591_v1  ;;  %v2528_v56 = vld [vmem:[%s3542_s0 + $0x190] ss:$8 sps:$4 sm:$0xff]   ;;  %v2531_v58 = vld [vmem:[%s3542_s0 + $0x1a4] ss:$8 sps:$4 sm:$0xff]   ;;  %v2534_v60 = vld [vmem:[%s3542_s0 + $0x1a0] ss:$8 sps:$4 sm:$0xff]  }
  0x22   : > { %v2535_v61 = vld [vmem:[%s3542_s0 + $0xb4] ss:$8 sps:$4 sm:$0xff]   ;;  %v2539_v63 = vld [vmem:[%s3542_s0 + $0xb0] ss:$8 sps:$4 sm:$0xff]   ;;  %v2543_v2 = vld [vmem:[%s3542_s0 + $0x1c4] ss:$8 sps:$4 sm:$0xff]  }
  0x23   : > { %v2537_v62 = vld [vmem:[%s3542_s0 + $0x1b4] ss:$8 sps:$4 sm:$0xff]   ;;  %v2540_v0 = vld [vmem:[%s3542_s0 + $0x1b0] ss:$8 sps:$4 sm:$0xff]   ;;  %v2545_v3 = vld [vmem:[%s3542_s0 + $0xc0] ss:$8 sps:$4 sm:$0xff]  }
  0x24   : > { %745 = vmatpush1.bf16.msra.mxu0 %v2458_v7  ;;  %2416 = vmatpush1.bf16.msra.mxu1 %v2458_v7  ;;  %v2546_v4 = vld [vmem:[%s3542_s0 + $0x1c0] ss:$8 sps:$4 sm:$0xff]   ;;  %v2547_v5 = vld [vmem:[%s3542_s0 + $0xd4] ss:$8 sps:$4 sm:$0xff]   ;;  %v2551_v7 = vld [vmem:[%s3542_s0 + $0xd0] ss:$8 sps:$4 sm:$0xff]  }
  0x25   : > { %746 = vmatprep.subr.bf16.mxu0 %v2591_v1  ;;  %2401 = vmatprep.subr.bf16.mxu1 %v2591_v1  ;;  %v2549_v6 = vld [vmem:[%s3542_s0 + $0x1d4] ss:$8 sps:$4 sm:$0xff]   ;;  %v2552_v8 = vld [vmem:[%s3542_s0 + $0x1d0] ss:$8 sps:$4 sm:$0xff]  }
  0x28   : > { %747 = vmatpush1.bf16.msra.mxu0 %v2459_v9  ;;  %2417 = vmatpush1.bf16.msra.mxu1 %v2459_v9  ;;  %v2553_v9 = vld [vmem:[%s3542_s0 + $0xe4] ss:$8 sps:$4 sm:$0xff]  }
  0x29   : > { %748 = vmatprep.subr.bf16.mxu0 %v2591_v1  ;;  %2402 = vmatprep.subr.bf16.mxu1 %v2591_v1 }
  0x2c   : > { %749 = vmatpush1.bf16.msra.mxu0 %v2460_v10  ;;  %2418 = vmatpush1.bf16.msra.mxu1 %v2460_v10  ;;  %v2555_v10 = vld [vmem:[%s3542_s0 + $0x1e4] ss:$8 sps:$4 sm:$0xff]  }
  0x2d   : > { %750 = vmatprep.subr.bf16.mxu0 %v2591_v1  ;;  %2403 = vmatprep.subr.bf16.mxu1 %v2591_v1 }
  0x30   : > { %751 = vmatpush1.bf16.msra.mxu0 %v2461_v11  ;;  %2419 = vmatpush1.bf16.msra.mxu1 %v2461_v11  ;;  %v2557_v11 = vld [vmem:[%s3542_s0 + $0xe0] ss:$8 sps:$4 sm:$0xff]  }
  0x31   : > { %752 = vmatprep.subr.bf16.mxu0 %v2591_v1  ;;  %2404 = vmatprep.subr.bf16.mxu1 %v2591_v1 }
  0x34   : > { %753 = vmatpush1.bf16.msra.mxu0 %v2462_v12  ;;  %2420 = vmatpush1.bf16.msra.mxu1 %v2462_v12  ;;  %v2558_v12 = vld [vmem:[%s3542_s0 + $0x1e0] ss:$8 sps:$4 sm:$0xff]  }
  0x35   : > { %754 = vmatprep.subr.bf16.mxu0 %v2591_v1  ;;  %2405 = vmatprep.subr.bf16.mxu1 %v2591_v1 }
  0x38   : > { %755 = vmatpush1.bf16.msra.mxu0 %v2463_v13  ;;  %2421 = vmatpush1.bf16.msra.mxu1 %v2463_v13  ;;  %v2559_v13 = vld [vmem:[%s3542_s0 + $0xf4] ss:$8 sps:$4 sm:$0xff]  }
  0x39   : > { %756 = vmatprep.subr.bf16.mxu0 %v2591_v1  ;;  %2406 = vmatprep.subr.bf16.mxu1 %v2591_v1 }
  0x3c   : > { %757 = vmatpush1.bf16.msra.mxu0 %v2464_v14  ;;  %2422 = vmatpush1.bf16.msra.mxu1 %v2464_v14  ;;  %v2561_v14 = vld [vmem:[%s3542_s0 + $0x1f4] ss:$8 sps:$4 sm:$0xff]  }
  0x3d   : > { %758 = vmatprep.subr.bf16.mxu0 %v2591_v1  ;;  %2407 = vmatprep.subr.bf16.mxu1 %v2591_v1 }
  0x40   : > { %759 = vmatpush1.bf16.msra.mxu0 %v2465_v15  ;;  %2423 = vmatpush1.bf16.msra.mxu1 %v2465_v15  ;;  %v2563_v15 = vld [vmem:[%s3542_s0 + $0xf0] ss:$8 sps:$4 sm:$0xff]  }
  0x41   : > { %760 = vmatprep.subr.bf16.mxu0 %v2591_v1  ;;  %2408 = vmatprep.subr.bf16.mxu1 %v2591_v1 }
  0x44   : > { %761 = vmatpush1.bf16.msra.mxu0 %v2466_v16  ;;  %2424 = vmatpush1.bf16.msra.mxu1 %v2466_v16  ;;  %v2564_v16 = vld [vmem:[%s3542_s0 + $0x1f0] ss:$8 sps:$4 sm:$0xff]  }
  0x45   : > { %762 = vmatprep.subr.bf16.mxu0 %v2591_v1  ;;  %2409 = vmatprep.subr.bf16.mxu1 %v2591_v1 }
  0x48   : > { %763 = vmatpush1.bf16.msra.mxu0 %v2467_v17  ;;  %2425 = vmatpush1.bf16.msra.mxu1 %v2467_v17 }
  0x49   : > { %764 = vmatprep.subr.bf16.mxu0 %v2591_v1  ;;  %2410 = vmatprep.subr.bf16.mxu1 %v2591_v1  ;;  %v2541_v1 = vld [vmem:[%s3542_s0 + $0xc4] ss:$8 sps:$4 sm:$0xff]  }
  0x4c   : > { %765 = vmatpush1.bf16.msra.mxu0 %v2468_v18  ;;  %2426 = vmatpush1.bf16.msra.mxu1 %v2468_v18 }
  0x4f   : > { %767 = vmatmul.mubr.bf16.vlgmr.msra.gmra.mrb[0].mxu0 %v2469_v19  ;;  %895 = vmatmul.mubr.bf16.vlgmr.msra.gmra.mrb[0].mxu1 %v2472_v20 }
  0x50   : > { %774 = vmatprep.mubr.bf16.mxu0 %v2475_v21  ;;  %902 = vmatprep.mubr.bf16.mxu1 %v2477_v22 }
  0x57   : > { %775 = vmatmul.mubr.bf16.gmra.mrb[4].mxu0 %v2479_v23  ;;  %903 = vmatmul.mubr.bf16.gmra.mrb[4].mxu1 %v2480_v24 }
  0x58   : > { %782 = vmatprep.mubr.bf16.mxu0 %v2481_v25  ;;  %910 = vmatprep.mubr.bf16.mxu1 %v2483_v26 }
  0x5f   : > { %783 = vmatmul.mubr.bf16.gmra.mrb[8].mxu0 %v2485_v27  ;;  %911 = vmatmul.mubr.bf16.gmra.mrb[8].mxu1 %v2486_v28 }
  0x60   : > { %790 = vmatprep.mubr.bf16.mxu0 %v2487_v29  ;;  %918 = vmatprep.mubr.bf16.mxu1 %v2489_v30 }
  0x67   : > { %791 = vmatmul.mubr.bf16.gmra.mrb[12].mxu0 %v2491_v31  ;;  %919 = vmatmul.mubr.bf16.gmra.mrb[12].mxu1 %v2492_v32 }
  0x68   : > { %798 = vmatprep.mubr.bf16.mxu0 %v2493_v33  ;;  %926 = vmatprep.mubr.bf16.mxu1 %v2495_v34 }
  0x6f   : > { %799 = vmatmul.mubr.bf16.gmra.mrb[16].mxu0 %v2497_v35  ;;  %927 = vmatmul.mubr.bf16.gmra.mrb[16].mxu1 %v2498_v36 }
  0x70   : > { %806 = vmatprep.mubr.bf16.mxu0 %v2499_v37  ;;  %934 = vmatprep.mubr.bf16.mxu1 %v2501_v38 }
  0x77   : > { %807 = vmatmul.mubr.bf16.gmra.mrb[20].mxu0 %v2503_v39  ;;  %935 = vmatmul.mubr.bf16.gmra.mrb[20].mxu1 %v2504_v40 }
  0x78   : > { %814 = vmatprep.mubr.bf16.mxu0 %v2505_v41  ;;  %942 = vmatprep.mubr.bf16.mxu1 %v2507_v42 }
  0x7f   : > { %815 = vmatmul.mubr.bf16.gmra.mrb[24].mxu0 %v2509_v43  ;;  %943 = vmatmul.mubr.bf16.gmra.mrb[24].mxu1 %v2510_v44 }
  0x80   : > { %822 = vmatprep.mubr.bf16.mxu0 %v2511_v45  ;;  %950 = vmatprep.mubr.bf16.mxu1 %v2513_v46 }
  0x87   : > { %823 = vmatmul.mubr.bf16.gmra.mrb[28].mxu0 %v2515_v47  ;;  %951 = vmatmul.mubr.bf16.gmra.mrb[28].mxu1 %v2516_v48 }
  0x88   : > { %830 = vmatprep.mubr.bf16.mxu0 %v2517_v49  ;;  %958 = vmatprep.mubr.bf16.mxu1 %v2519_v50 }
  0x8f   : > { %831 = vmatmul.mubr.bf16.gmra.mrb[32].mxu0 %v2521_v51  ;;  %959 = vmatmul.mubr.bf16.gmra.mrb[32].mxu1 %v2522_v52 }
  0x90   : > { %838 = vmatprep.mubr.bf16.mxu0 %v2523_v53  ;;  %966 = vmatprep.mubr.bf16.mxu1 %v2525_v54 }
  0x97   : > { %839 = vmatmul.mubr.bf16.gmra.mrb[36].mxu0 %v2527_v55  ;;  %967 = vmatmul.mubr.bf16.gmra.mrb[36].mxu1 %v2528_v56 }
  0x98   : > { %846 = vmatprep.mubr.bf16.mxu0 %v2529_v57  ;;  %974 = vmatprep.mubr.bf16.mxu1 %v2531_v58 }
  0x9f   : > { %847 = vmatmul.mubr.bf16.gmra.mrb[40].mxu0 %v2533_v59  ;;  %975 = vmatmul.mubr.bf16.gmra.mrb[40].mxu1 %v2534_v60 }
  0xa0   : > { %854 = vmatprep.mubr.bf16.mxu0 %v2535_v61  ;;  %982 = vmatprep.mubr.bf16.mxu1 %v2537_v62 }
  0xa7   : > { %855 = vmatmul.mubr.bf16.gmra.mrb[44].mxu0 %v2539_v63  ;;  %983 = vmatmul.mubr.bf16.gmra.mrb[44].mxu1 %v2540_v0 }
  0xa8   : > { %862 = vmatprep.mubr.bf16.mxu0 %v2541_v1  ;;  %990 = vmatprep.mubr.bf16.mxu1 %v2543_v2 }
  0xaf   : > { %863 = vmatmul.mubr.bf16.gmra.mrb[48].mxu0 %v2545_v3  ;;  %991 = vmatmul.mubr.bf16.gmra.mrb[48].mxu1 %v2546_v4 }
  0xb0   : > { %870 = vmatprep.mubr.bf16.mxu0 %v2547_v5  ;;  %998 = vmatprep.mubr.bf16.mxu1 %v2549_v6 }
  0xb7   : > { %871 = vmatmul.mubr.bf16.gmra.mrb[52].mxu0 %v2551_v7  ;;  %999 = vmatmul.mubr.bf16.gmra.mrb[52].mxu1 %v2552_v8 }
  0xb8   : > { %878 = vmatprep.mubr.bf16.mxu0 %v2553_v9  ;;  %1006 = vmatprep.mubr.bf16.mxu1 %v2555_v10 }
  0xbf   : > { %879 = vmatmul.mubr.bf16.gmra.mrb[56].mxu0 %v2557_v11  ;;  %1007 = vmatmul.mubr.bf16.gmra.mrb[56].mxu1 %v2558_v12 }
  0xc0   : > { %886 = vmatprep.mubr.bf16.mxu0 %v2559_v13  ;;  %1014 = vmatprep.mubr.bf16.mxu1 %v2561_v14 }
  0xc7   : > { %887 = vmatmul.mubr.bf16.gmra.mrb[60].mxu0 %v2563_v15  ;;  %1015 = vmatmul.mubr.bf16.gmra.mrb[60].mxu1 %v2564_v16 }
 0x122   : > { %v2911_v17 = vpop.f32.mrb[0].mxu0  ;;  %v2913_v18 = vpop.f32.mrb[0].mxu1 }
 0x123   : > { %3573 = vst [vmem:[#allocation4_spill] sm:$0xff] %v2911_v17  ;;  %v770_v19 = vpop.f32.mrb[1].mxu0  ;;  %v898_v20 = vpop.f32.mrb[1].mxu1 }
 0x124   : > { %v2915_v21 = vpop.f32.mrb[2].mxu0  ;;  %v2917_v22 = vpop.f32.mrb[2].mxu1 }
 0x125   : > { %3574 = vst [vmem:[#allocation5_spill] sm:$0xff] %v2915_v21  ;;  %v773_v23 = vpop.f32.mrb[3].mxu0  ;;  %v901_v24 = vpop.f32.mrb[3].mxu1 }
 0x12a   : > { %v2919_v25 = vpop.f32.mrb[4].mxu0  ;;  %v2921_v26 = vpop.f32.mrb[4].mxu1 }
 0x12b   : > { %3575 = vst [vmem:[#allocation6_spill] sm:$0xff] %v2919_v25  ;;  %v778_v27 = vpop.f32.mrb[5].mxu0  ;;  %v906_v28 = vpop.f32.mrb[5].mxu1 }
 0x12c   : > { %v2923_v29 = vpop.f32.mrb[6].mxu0  ;;  %v2925_v30 = vpop.f32.mrb[6].mxu1 }
 0x12d   : > { %v781_v31 = vpop.f32.mrb[7].mxu0  ;;  %v909_v32 = vpop.f32.mrb[7].mxu1 }
 0x132   : > { %v2927_v33 = vpop.f32.mrb[8].mxu0  ;;  %v2929_v34 = vpop.f32.mrb[8].mxu1 }
 0x133   : > { %v786_v35 = vpop.f32.mrb[9].mxu0  ;;  %v914_v36 = vpop.f32.mrb[9].mxu1 }
 0x134   : > { %v2931_v37 = vpop.f32.mrb[10].mxu0  ;;  %v2933_v38 = vpop.f32.mrb[10].mxu1 }
 0x135   : > { %v789_v39 = vpop.f32.mrb[11].mxu0  ;;  %v917_v40 = vpop.f32.mrb[11].mxu1 }
 0x13a   : > { %v2935_v41 = vpop.f32.mrb[12].mxu0  ;;  %v2937_v42 = vpop.f32.mrb[12].mxu1 }
 0x13b   : > { %v794_v43 = vpop.f32.mrb[13].mxu0  ;;  %v922_v44 = vpop.f32.mrb[13].mxu1 }
 0x13c   : > { %v2939_v45 = vpop.f32.mrb[14].mxu0  ;;  %v2941_v46 = vpop.f32.mrb[14].mxu1 }
 0x13d   : > { %v797_v47 = vpop.f32.mrb[15].mxu0  ;;  %v925_v48 = vpop.f32.mrb[15].mxu1 }
 0x142   : > { %v2943_v49 = vpop.f32.mrb[16].mxu0  ;;  %v2945_v50 = vpop.f32.mrb[16].mxu1 }
 0x143   : > { %v802_v51 = vpop.f32.mrb[17].mxu0  ;;  %v930_v52 = vpop.f32.mrb[17].mxu1 }
 0x144   : > { %v2947_v53 = vpop.f32.mrb[18].mxu0  ;;  %v2949_v54 = vpop.f32.mrb[18].mxu1 }
 0x145   : > { %3576 = vst [vmem:[#allocation7_spill] sm:$0xff] %v2949_v54  ;;  %v805_v55 = vpop.f32.mrb[19].mxu0  ;;  %v933_v56 = vpop.f32.mrb[19].mxu1 }
 0x14a   : > { %v2951_v57 = vpop.f32.mrb[20].mxu0  ;;  %v2953_v58 = vpop.f32.mrb[20].mxu1 }
 0x14b   : > { %3577 = vst [vmem:[#allocation8_spill] sm:$0xff] %v2953_v58  ;;  %v810_v59 = vpop.f32.mrb[21].mxu0  ;;  %v938_v60 = vpop.f32.mrb[21].mxu1 }
 0x14c   : > { %v2955_v61 = vpop.f32.mrb[22].mxu0  ;;  %v2957_v62 = vpop.f32.mrb[22].mxu1 }
 0x14d   : > { %3578 = vst [vmem:[#allocation9_spill] sm:$0xff] %v2957_v62  ;;  %v813_v63 = vpop.f32.mrb[23].mxu0  ;;  %v941_v0 = vpop.f32.mrb[23].mxu1 }
 0x152   : > { %v2959_v1 = vpop.f32.mrb[24].mxu0  ;;  %v2961_v2 = vpop.f32.mrb[24].mxu1 }
 0x153   : > { %3579 = vst [vmem:[#allocation10_spill] sm:$0xff] %v2961_v2  ;;  %v818_v3 = vpop.f32.mrb[25].mxu0  ;;  %v946_v4 = vpop.f32.mrb[25].mxu1 }
 0x154   : > { %v2963_v5 = vpop.f32.mrb[26].mxu0  ;;  %v2965_v6 = vpop.f32.mrb[26].mxu1 }
 0x155   : > { %3580 = vst [vmem:[#allocation11_spill] sm:$0xff] %v2965_v6  ;;  %v821_v7 = vpop.f32.mrb[27].mxu0  ;;  %v949_v8 = vpop.f32.mrb[27].mxu1 }
 0x15a   : > { %v2967_v9 = vpop.f32.mrb[28].mxu0  ;;  %v2969_v10 = vpop.f32.mrb[28].mxu1 }
 0x15b   : > { %3581 = vst [vmem:[#allocation12_spill] sm:$0xff] %v2969_v10  ;;  %v826_v11 = vpop.f32.mrb[29].mxu0  ;;  %v954_v12 = vpop.f32.mrb[29].mxu1 }
 0x15c   : > { %v2971_v13 = vpop.f32.mrb[30].mxu0  ;;  %v2973_v14 = vpop.f32.mrb[30].mxu1 }
 0x15d   : > { %3582 = vst [vmem:[#allocation13_spill] sm:$0xff] %v2973_v14  ;;  %v829_v15 = vpop.f32.mrb[31].mxu0  ;;  %v957_v16 = vpop.f32.mrb[31].mxu1 }
 0x162   : > { %v2975_v19 = vpop.f32.mrb[32].mxu0  ;;  %v2977_v20 = vpop.f32.mrb[32].mxu1 }
 0x163   : > { %3583 = vst [vmem:[#allocation14_spill] sm:$0xff] %v2977_v20  ;;  %v834_v23 = vpop.f32.mrb[33].mxu0  ;;  %v962_v24 = vpop.f32.mrb[33].mxu1 }
 0x164   : > { %v2979_v27 = vpop.f32.mrb[34].mxu0  ;;  %v2981_v28 = vpop.f32.mrb[34].mxu1 }
 0x165   : > { %3584 = vst [vmem:[#allocation15_spill] sm:$0xff] %v2981_v28  ;;  %v837_v31 = vpop.f32.mrb[35].mxu0  ;;  %v965_v32 = vpop.f32.mrb[35].mxu1 }
 0x16a   : > { %v2983_v35 = vpop.f32.mrb[36].mxu0  ;;  %v2985_v36 = vpop.f32.mrb[36].mxu1 }
 0x16b   : > { %3585 = vst [vmem:[#allocation16_spill] sm:$0xff] %v2985_v36  ;;  %v842_v39 = vpop.f32.mrb[37].mxu0  ;;  %v970_v40 = vpop.f32.mrb[37].mxu1 }
 0x16c   : > { %v2987_v43 = vpop.f32.mrb[38].mxu0  ;;  %v2989_v44 = vpop.f32.mrb[38].mxu1 }
 0x16d   : > { %3586 = vst [vmem:[#allocation17_spill] sm:$0xff] %v2989_v44  ;;  %v845_v47 = vpop.f32.mrb[39].mxu0  ;;  %v973_v48 = vpop.f32.mrb[39].mxu1 }
 0x172   : > { %v2991_v51 = vpop.f32.mrb[40].mxu0  ;;  %v2993_v52 = vpop.f32.mrb[40].mxu1 }
 0x173   : > { %3587 = vst [vmem:[#allocation18_spill] sm:$0xff] %v2993_v52  ;;  %v850_v55 = vpop.f32.mrb[41].mxu0  ;;  %v978_v56 = vpop.f32.mrb[41].mxu1 }
 0x174   : > { %v2995_v59 = vpop.f32.mrb[42].mxu0  ;;  %v2997_v60 = vpop.f32.mrb[42].mxu1 }
 0x175   : > { %3588 = vst [vmem:[#allocation19_spill] sm:$0xff] %v2997_v60  ;;  %v853_v63 = vpop.f32.mrb[43].mxu0  ;;  %v981_v0 = vpop.f32.mrb[43].mxu1 }
 0x17a   : > { %v2999_v3 = vpop.f32.mrb[44].mxu0  ;;  %v3001_v4 = vpop.f32.mrb[44].mxu1 }
 0x17b   : > { %3589 = vst [vmem:[#allocation20_spill] sm:$0xff] %v3001_v4  ;;  %v858_v7 = vpop.f32.mrb[45].mxu0  ;;  %v986_v8 = vpop.f32.mrb[45].mxu1 }
 0x17c   : > { %v3003_v11 = vpop.f32.mrb[46].mxu0  ;;  %v3005_v12 = vpop.f32.mrb[46].mxu1 }
 0x17d   : > { %3590 = vst [vmem:[#allocation21_spill] sm:$0xff] %v3005_v12  ;;  %v861_v15 = vpop.f32.mrb[47].mxu0  ;;  %v989_v16 = vpop.f32.mrb[47].mxu1 }
 0x182   : > { %v3007_v23 = vpop.f32.mrb[48].mxu0  ;;  %v3009_v24 = vpop.f32.mrb[48].mxu1 }
 0x183   : > { %3591 = vst [vmem:[#allocation22_spill] sm:$0xff] %v3009_v24  ;;  %v866_v31 = vpop.f32.mrb[49].mxu0  ;;  %v994_v32 = vpop.f32.mrb[49].mxu1 }
 0x184   : > { %v3011_v39 = vpop.f32.mrb[50].mxu0  ;;  %v3013_v40 = vpop.f32.mrb[50].mxu1 }
 0x185   : > { %3592 = vst [vmem:[#allocation23_spill] sm:$0xff] %v3013_v40  ;;  %v869_v47 = vpop.f32.mrb[51].mxu0  ;;  %v997_v48 = vpop.f32.mrb[51].mxu1 }
 0x18a   : > { %v3015_v55 = vpop.f32.mrb[52].mxu0  ;;  %v3017_v56 = vpop.f32.mrb[52].mxu1 }
 0x18b   : > { %3593 = vst [vmem:[#allocation24_spill] sm:$0xff] %v3017_v56  ;;  %v874_v63 = vpop.f32.mrb[53].mxu0  ;;  %v1002_v0 = vpop.f32.mrb[53].mxu1 }
 0x18c   : > { %v3019_v7 = vpop.f32.mrb[54].mxu0  ;;  %v3021_v8 = vpop.f32.mrb[54].mxu1 }
 0x18d   : > { %3594 = vst [vmem:[#allocation25_spill] sm:$0xff] %v3021_v8  ;;  %v877_v15 = vpop.f32.mrb[55].mxu0  ;;  %v1005_v16 = vpop.f32.mrb[55].mxu1 }
 0x192   : > { %v3023_v31 = vpop.f32.mrb[56].mxu0  ;;  %v3025_v32 = vpop.f32.mrb[56].mxu1 }
 0x193   : > { %3595 = vst [vmem:[#allocation26_spill] sm:$0xff] %v3025_v32  ;;  %v882_v24 = vpop.f32.mrb[57].mxu0  ;;  %v1010_v40 = vpop.f32.mrb[57].mxu1 }
 0x194   : > { %v3027_v47 = vpop.f32.mrb[58].mxu0  ;;  %v3029_v48 = vpop.f32.mrb[58].mxu1  ;;  %v2592_v24 = vmov (%p1023_p4), 0.0  }
 0x195   : > { %3596 = vst [vmem:[#allocation27_spill] sm:$0xff] %v3029_v48  ;;  %v885_v12 = vpop.f32.mrb[59].mxu0  ;;  %v1013_v56 = vpop.f32.mrb[59].mxu1  ;;  %1029 = vst [vmem:[#allocation2] sm:$0x1] (%p1023_p4), %v2592_v24 }
 0x196   : > { %1030 = vst [vmem:[#allocation3] sm:$0x1] (%p1023_p4), %v2592_v24 }
 0x197   : > { %1028 = sbr.rel (!%p1023_p4) target bundleno = 414 (0x19e), region = 40 }
 0x19a   : > { %v3031_v63 = vpop.f32.mrb[60].mxu0  ;;  %v3033_v0 = vpop.f32.mrb[60].mxu1 }
 0x19b   : > { %3597 = vst [vmem:[#allocation28_spill] sm:$0xff] %v3033_v0  ;;  %v890_v4 = vpop.f32.mrb[61].mxu0  ;;  %v1018_v8 = vpop.f32.mrb[61].mxu1 }
 0x19c   : > { %v3035_v15 = vpop.f32.mrb[62].mxu0  ;;  %v3037_v16 = vpop.f32.mrb[62].mxu1 }
 0x19d   : > { %3598 = vst [vmem:[#allocation29_spill] sm:$0xff] %v3037_v16  ;;  %v893_v60 = vpop.f32.mrb[63].mxu0  ;;  %v1021_v32 = vpop.f32.mrb[63].mxu1 }
 0x19e PF: > { %p2069_p5 = scmp.ne.s32.totalorder %s2581_s15, 0 }
 0x19f   : > { %v1035_v4 = vadd.f32 (!%p2069_p5), %v2915_v21, %v2911_v17  ;;  %v1107_v16 = vmul.f32 (!%p2069_p5), %v2911_v17, %v2911_v17  ;;  %v1108_v0 = vmul.f32 (!%p2069_p5), %v2915_v21, %v2915_v21 }
 0x1a0   : > { %1033 = sbr.rel (%p2069_p5) target bundleno = 568 (0x238), region = 44 }
 0x1a1   : > { %v1036_v12 = vadd.f32 (!%p2069_p5), %v1035_v4, %v2919_v25 }
 0x1a3   : > { %v1037_v40 = vadd.f32 (!%p2069_p5), %v1036_v12, %v2923_v29  ;;  %v1109_v12 = vmul.f32 (!%p2069_p5), %v2919_v25, %v2919_v25 }
 0x1a5   : > { %v1038_v60 = vadd.f32 (!%p2069_p5), %v1037_v40, %v2927_v33 }
 0x1a7   : > { %v1039_v56 = vadd.f32 %v1038_v60, %v2931_v37  ;;  %v1110_v60 = vmul.f32 %v2923_v29, %v2923_v29 }
 0x1a9   : > { %v1040_v8 = vadd.f32 %v1039_v56, %v2935_v41  ;;  %v1171_v56 = vadd.f32 %v1108_v0, %v1107_v16  ;;  %v1114_v16 = vmul.f32 %v2939_v45, %v2939_v45 }
 0x1ab   : > { %v1041_v32 = vadd.f32 %v1040_v8, %v2939_v45  ;;  %v1172_v17 = vadd.f32 %v1171_v56, %v1109_v12  ;;  %v1115_v56 = vmul.f32 %v2943_v49, %v2943_v49 }
 0x1ad   : > { %v1042_v24 = vadd.f32 %v1041_v32, %v2943_v49  ;;  %v1111_v32 = vmul.f32 %v2927_v33, %v2927_v33  ;;  %v1173_v21 = vadd.f32 %v1172_v17, %v1110_v60 }
 0x1af   : > { %v1043_v4 = vadd.f32 %v1042_v24, %v2947_v53  ;;  %v1112_v24 = vmul.f32 %v2931_v37, %v2931_v37  ;;  %v1174_v52 = vadd.f32 %v1173_v21, %v1111_v32 }
 0x1b1   : > { %v1044_v40 = vadd.f32 %v1043_v4, %v2951_v57  ;;  %v1113_v4 = vmul.f32 %v2935_v41, %v2935_v41 }
 0x1b3   : > { %v1045_v8 = vadd.f32 %v1044_v40, %v2955_v61  ;;  %v1175_v40 = vadd.f32 %v1174_v52, %v1112_v24  ;;  %v1118_v24 = vmul.f32 %v2955_v61, %v2955_v61 }
 0x1b5   : > { %v1046_v48 = vadd.f32 %v1045_v8, %v2959_v1  ;;  %v1176_v8 = vadd.f32 %v1175_v40, %v1113_v4  ;;  %v1119_v40 = vmul.f32 %v2959_v1, %v2959_v1 }
 0x1b7   : > { %v1047_v25 = vadd.f32 %v1046_v48, %v2963_v5  ;;  %v1116_v48 = vmul.f32 %v2947_v53, %v2947_v53  ;;  %v1177_v60 = vadd.f32 %v1176_v8, %v1114_v16  ;;  %v1120_v8 = vmul.f32 %v2963_v5, %v2963_v5 }
 0x1b9   : > { %v1048_v0 = vadd.f32 %v1047_v25, %v2967_v9  ;;  %v1117_v25 = vmul.f32 %v2951_v57, %v2951_v57  ;;  %v1178_v32 = vadd.f32 %v1177_v60, %v1115_v56  ;;  %v1121_v60 = vmul.f32 %v2967_v9, %v2967_v9 }
 0x1bb   : > { %v1049_v12 = vadd.f32 %v1048_v0, %v2971_v13  ;;  %v1179_v0 = vadd.f32 %v1178_v32, %v1116_v48  ;;  %v1122_v32 = vmul.f32 %v2971_v13, %v2971_v13 }
 0x1bd   : > { %v1050_v17 = vadd.f32 %v1049_v12, %v2975_v19  ;;  %v1180_v12 = vadd.f32 %v1179_v0, %v1117_v25  ;;  %v1123_v0 = vmul.f32 %v2975_v19, %v2975_v19 }
 0x1bf   : > { %v1051_v21 = vadd.f32 %v1050_v17, %v2979_v27  ;;  %v1181_v17 = vadd.f32 %v1180_v12, %v1118_v24  ;;  %v1124_v12 = vmul.f32 %v2979_v27, %v2979_v27 }
 0x1c1   : > { %v1052_v52 = vadd.f32 %v1051_v21, %v2983_v35  ;;  %v1182_v21 = vadd.f32 %v1181_v17, %v1119_v40  ;;  %v1125_v17 = vmul.f32 %v2983_v35, %v2983_v35 }
 0x1c3   : > { %v1053_v4 = vadd.f32 %v1052_v52, %v2987_v43  ;;  %v1183_v52 = vadd.f32 %v1182_v21, %v1120_v8  ;;  %v1126_v21 = vmul.f32 %v2987_v43, %v2987_v43 }
 0x1c5   : > { %v1054_v16 = vadd.f32 %v1053_v4, %v2991_v51  ;;  %v1184_v4 = vadd.f32 %v1183_v52, %v1121_v60  ;;  %v1127_v52 = vmul.f32 %v2991_v51, %v2991_v51 }
 0x1c7   : > { %v1055_v56 = vadd.f32 %v1054_v16, %v2995_v59  ;;  %v1185_v16 = vadd.f32 %v1184_v4, %v1122_v32  ;;  %v1128_v4 = vmul.f32 %v2995_v59, %v2995_v59 }
 0x1c9   : > { %v1056_v48 = vadd.f32 %v1055_v56, %v2999_v3  ;;  %v1186_v56 = vadd.f32 %v1185_v16, %v1123_v0  ;;  %v1129_v16 = vmul.f32 %v2999_v3, %v2999_v3 }
 0x1cb   : > { %v1057_v25 = vadd.f32 %v1056_v48, %v3003_v11  ;;  %v1187_v48 = vadd.f32 %v1186_v56, %v1124_v12  ;;  %v1130_v56 = vmul.f32 %v3003_v11, %v3003_v11 }
 0x1cd   : > { %v1058_v24 = vadd.f32 %v1057_v25, %v3007_v23  ;;  %v1188_v25 = vadd.f32 %v1187_v48, %v1125_v17  ;;  %v1131_v48 = vmul.f32 %v3007_v23, %v3007_v23 }
 0x1cf   : > { %v1059_v40 = vadd.f32 %v1058_v24, %v3011_v39  ;;  %v1189_v24 = vadd.f32 %v1188_v25, %v1126_v21  ;;  %v1132_v25 = vmul.f32 %v3011_v39, %v3011_v39 }
 0x1d1   : > { %v1060_v8 = vadd.f32 %v1059_v40, %v3015_v55  ;;  %v1190_v40 = vadd.f32 %v1189_v24, %v1127_v52  ;;  %v1133_v24 = vmul.f32 %v3015_v55, %v3015_v55 }
 0x1d3   : > { %v1061_v60 = vadd.f32 %v1060_v8, %v3019_v7  ;;  %v1191_v8 = vadd.f32 %v1190_v40, %v1128_v4  ;;  %v1134_v40 = vmul.f32 %v3019_v7, %v3019_v7 }
 0x1d5   : > { %v1062_v32 = vadd.f32 %v1061_v60, %v3023_v31  ;;  %v1192_v60 = vadd.f32 %v1191_v8, %v1129_v16  ;;  %v1135_v8 = vmul.f32 %v3023_v31, %v3023_v31 }
 0x1d7   : > { %v1063_v0 = vadd.f32 %v1062_v32, %v3027_v47  ;;  %v1193_v32 = vadd.f32 %v1192_v60, %v1130_v56  ;;  %v1136_v60 = vmul.f32 %v3027_v47, %v3027_v47 }
 0x1d9   : > { %v1064_v12 = vadd.f32 %v1063_v0, %v3031_v63  ;;  %v1194_v0 = vadd.f32 %v1193_v32, %v1131_v48  ;;  %v1137_v32 = vmul.f32 %v3031_v63, %v3031_v63 }
 0x1db   : > { %v1065_v17 = vadd.f32 %v1064_v12, %v3035_v15  ;;  %v1195_v12 = vadd.f32 %v1194_v0, %v1132_v25  ;;  %v1138_v0 = vmul.f32 %v3035_v15, %v3035_v15 }
 0x1dd   : > { %v1066_v21 = vadd.f32 %v1065_v17, %v2913_v18  ;;  %v1196_v17 = vadd.f32 %v1195_v12, %v1133_v24  ;;  %v1139_v12 = vmul.f32 %v2913_v18, %v2913_v18 }
 0x1df   : > { %v1067_v52 = vadd.f32 %v1066_v21, %v2917_v22  ;;  %v1197_v21 = vadd.f32 %v1196_v17, %v1134_v40  ;;  %v1140_v17 = vmul.f32 %v2917_v22, %v2917_v22 }
 0x1e1   : > { %v1068_v4 = vadd.f32 %v1067_v52, %v2921_v26  ;;  %v1198_v52 = vadd.f32 %v1197_v21, %v1135_v8  ;;  %v1141_v21 = vmul.f32 %v2921_v26, %v2921_v26 }
 0x1e3   : > { %v1069_v16 = vadd.f32 %v1068_v4, %v2925_v30  ;;  %v1199_v4 = vadd.f32 %v1198_v52, %v1136_v60  ;;  %v1142_v52 = vmul.f32 %v2925_v30, %v2925_v30 }
 0x1e5   : > { %v1070_v56 = vadd.f32 %v1069_v16, %v2929_v34  ;;  %v1200_v16 = vadd.f32 %v1199_v4, %v1137_v32  ;;  %v1143_v4 = vmul.f32 %v2929_v34, %v2929_v34 }
 0x1e7   : > { %v1071_v48 = vadd.f32 %v1070_v56, %v2933_v38  ;;  %v1201_v56 = vadd.f32 %v1200_v16, %v1138_v0  ;;  %v1144_v16 = vmul.f32 %v2933_v38, %v2933_v38 }
 0x1e9   : > { %v1072_v25 = vadd.f32 %v1071_v48, %v2937_v42  ;;  %v1202_v48 = vadd.f32 %v1201_v56, %v1139_v12  ;;  %v1145_v56 = vmul.f32 %v2937_v42, %v2937_v42 }
 0x1eb   : > { %v1073_v24 = vadd.f32 %v1072_v25, %v2941_v46  ;;  %v1203_v25 = vadd.f32 %v1202_v48, %v1140_v17  ;;  %v1146_v48 = vmul.f32 %v2941_v46, %v2941_v46 }
 0x1ed   : > { %v1074_v40 = vadd.f32 %v1073_v24, %v2945_v50  ;;  %v1204_v24 = vadd.f32 %v1203_v25, %v1141_v21  ;;  %v1147_v25 = vmul.f32 %v2945_v50, %v2945_v50 }
 0x1ef   : > { %v1075_v8 = vadd.f32 %v1074_v40, %v2949_v54  ;;  %v1205_v40 = vadd.f32 %v1204_v24, %v1142_v52  ;;  %v1148_v24 = vmul.f32 %v2949_v54, %v2949_v54  ;;  %v3599_v54 = vld [vmem:[#allocation18_spill] sm:$0xff] }
 0x1f1   : > { %v1076_v60 = vadd.f32 %v1075_v8, %v2953_v58  ;;  %v1206_v8 = vadd.f32 %v1205_v40, %v1143_v4  ;;  %v1149_v40 = vmul.f32 %v2953_v58, %v2953_v58  ;;  %v3600_v58 = vld [vmem:[#allocation19_spill] sm:$0xff] }
 0x1f3   : > { %v1077_v32 = vadd.f32 %v1076_v60, %v2957_v62  ;;  %v1207_v60 = vadd.f32 %v1206_v8, %v1144_v16  ;;  %v1150_v8 = vmul.f32 %v2957_v62, %v2957_v62  ;;  %v3601_v62 = vld [vmem:[#allocation20_spill] sm:$0xff] }
 0x1f5   : > { %v1078_v0 = vadd.f32 %v1077_v32, %v2961_v2  ;;  %v1208_v32 = vadd.f32 %v1207_v60, %v1145_v56  ;;  %v1151_v60 = vmul.f32 %v2961_v2, %v2961_v2  ;;  %v3602_v2 = vld [vmem:[#allocation21_spill] sm:$0xff] }
 0x1f7   : > { %v1079_v12 = vadd.f32 %v1078_v0, %v2965_v6  ;;  %v1209_v0 = vadd.f32 %v1208_v32, %v1146_v48  ;;  %v1152_v32 = vmul.f32 %v2965_v6, %v2965_v6  ;;  %v3603_v6 = vld [vmem:[#allocation22_spill] sm:$0xff] }
 0x1f9   : > { %v1080_v17 = vadd.f32 %v1079_v12, %v2969_v10  ;;  %v1210_v12 = vadd.f32 %v1209_v0, %v1147_v25  ;;  %v1153_v0 = vmul.f32 %v2969_v10, %v2969_v10  ;;  %v3604_v10 = vld [vmem:[#allocation23_spill] sm:$0xff] }
 0x1fb   : > { %v1081_v21 = vadd.f32 %v1080_v17, %v2973_v14  ;;  %v1211_v17 = vadd.f32 %v1210_v12, %v1148_v24  ;;  %v1154_v12 = vmul.f32 %v2973_v14, %v2973_v14  ;;  %v3605_v14 = vld [vmem:[#allocation24_spill] sm:$0xff] }
 0x1fd   : > { %v1082_v52 = vadd.f32 %v1081_v21, %v2977_v20  ;;  %v1212_v21 = vadd.f32 %v1211_v17, %v1149_v40  ;;  %v1155_v17 = vmul.f32 %v2977_v20, %v2977_v20  ;;  %v3606_v20 = vld [vmem:[#allocation25_spill] sm:$0xff] }
 0x1ff   : > { %v1083_v4 = vadd.f32 %v1082_v52, %v2981_v28  ;;  %v1213_v52 = vadd.f32 %v1212_v21, %v1150_v8  ;;  %v1156_v21 = vmul.f32 %v2981_v28, %v2981_v28  ;;  %v3607_v28 = vld [vmem:[#allocation26_spill] sm:$0xff] }
 0x201   : > { %v1084_v16 = vadd.f32 %v1083_v4, %v2985_v36  ;;  %v1214_v4 = vadd.f32 %v1213_v52, %v1151_v60  ;;  %v1157_v52 = vmul.f32 %v2985_v36, %v2985_v36  ;;  %v3608_v36 = vld [vmem:[#allocation27_spill] sm:$0xff] }
 0x203   : > { %v1085_v56 = vadd.f32 %v1084_v16, %v2989_v44  ;;  %v1215_v16 = vadd.f32 %v1214_v4, %v1152_v32  ;;  %v1158_v4 = vmul.f32 %v2989_v44, %v2989_v44  ;;  %v3609_v44 = vld [vmem:[#allocation28_spill] sm:$0xff] }
 0x205   : > { %v1086_v48 = vadd.f32 %v1085_v56, %v3599_v54  ;;  %v1216_v56 = vadd.f32 %v1215_v16, %v1153_v0  ;;  %v1159_v16 = vmul.f32 %v3599_v54, %v3599_v54  ;;  %v3610_v54 = vld [vmem:[#allocation29_spill] sm:$0xff] }
 0x207   : > { %v1087_v25 = vadd.f32 %v1086_v48, %v3600_v58  ;;  %v1217_v48 = vadd.f32 %v1216_v56, %v1154_v12  ;;  %v1160_v56 = vmul.f32 %v3600_v58, %v3600_v58 }
 0x209   : > { %v1088_v24 = vadd.f32 %v1087_v25, %v3601_v62  ;;  %v1218_v25 = vadd.f32 %v1217_v48, %v1155_v17  ;;  %v1161_v48 = vmul.f32 %v3601_v62, %v3601_v62  ;;  %v1165_v62 = vmul.f32 %v3605_v14, %v3605_v14 }
 0x20b   : > { %v1089_v40 = vadd.f32 %v1088_v24, %v3602_v2  ;;  %v1219_v24 = vadd.f32 %v1218_v25, %v1156_v21  ;;  %v1162_v25 = vmul.f32 %v3602_v2, %v3602_v2  ;;  %v1166_v2 = vmul.f32 %v3606_v20, %v3606_v20 }
 0x20d   : > { %v1090_v8 = vadd.f32 %v1089_v40, %v3603_v6  ;;  %v1220_v40 = vadd.f32 %v1219_v24, %v1157_v52  ;;  %v1163_v24 = vmul.f32 %v3603_v6, %v3603_v6  ;;  %v1167_v6 = vmul.f32 %v3607_v28, %v3607_v28 }
 0x20f   : > { %v1091_v60 = vadd.f32 %v1090_v8, %v3604_v10  ;;  %v1221_v8 = vadd.f32 %v1220_v40, %v1158_v4  ;;  %v1164_v4 = vmul.f32 %v3604_v10, %v3604_v10  ;;  %v1168_v10 = vmul.f32 %v3608_v36, %v3608_v36 }
 0x211   : > { %v1092_v32 = vadd.f32 %v1091_v60, %v3605_v14  ;;  %v1222_v60 = vadd.f32 %v1221_v8, %v1159_v16  ;;  %v1169_v14 = vmul.f32 %v3609_v44, %v3609_v44 }
 0x213   : > { %v1093_v0 = vadd.f32 %v1092_v32, %v3606_v20  ;;  %v1223_v32 = vadd.f32 %v1222_v60, %v1160_v56  ;;  %v1170_v20 = vmul.f32 %v3610_v54, %v3610_v54 }
 0x215   : > { %v1094_v12 = vadd.f32 %v1093_v0, %v3607_v28  ;;  %v1224_v0 = vadd.f32 %v1223_v32, %v1161_v48 }
 0x217   : > { %v1095_v17 = vadd.f32 %v1094_v12, %v3608_v36  ;;  %v1225_v40 = vadd.f32 %v1224_v0, %v1162_v25  ;;  %v1034_v25 = vld [vmem:[#allocation2] sm:$0x1] }
 0x219   : > { %v1096_v21 = vadd.f32 %v1095_v17, %v3609_v44  ;;  %v1226_v16 = vadd.f32 %v1225_v40, %v1163_v24 }
 0x21b   : > { %v1097_v52 = vadd.f32 %v1096_v21, %v3610_v54  ;;  %v1227_v56 = vadd.f32 %v1226_v16, %v1164_v4  ;;  %v1106_v16 = vld [vmem:[#allocation3] sm:$0x1] }
 0x21d   : > { %v1098_v58 = vrot.slane %v1097_v52, 4  ;;  %v1228_v48 = vadd.f32 %v1227_v56, %v1165_v62 }
 0x21f   : > { %v1099_v12 = vadd.f32 %v1098_v58, %v1097_v52  ;;  %v1229_v21 = vadd.f32 %v1228_v48, %v1166_v2 }
 0x221   : > { %v1100_v8 = vrot.slane %v1099_v12, 2  ;;  %v1230_v52 = vadd.f32 %v1229_v21, %v1167_v6 }
 0x223   : > { %v1101_v17 = vadd.f32 %v1100_v8, %v1099_v12  ;;  %v1231_v0 = vadd.f32 %v1230_v52, %v1168_v10 }
 0x225   : > { %v1102_v60 = vrot.slane %v1101_v17, 1  ;;  %v1232_v58 = vadd.f32 %v1231_v0, %v1169_v14 }
 0x227   : > { %v1103_v32 = vadd.f32 %v1102_v60, %v1101_v17  ;;  %v1233_v28 = vadd.f32 %v1232_v58, %v1170_v20 }
 0x229   : > { %v1104_v24 = vadd.f32 %v1103_v32, %v1034_v25  ;;  %v1234_v4 = vrot.slane %v1233_v28, 4 }
 0x22b   : > { %1105 = vst [vmem:[#allocation2] sm:$0x1] %v1104_v24  ;;  %v1235_v40 = vadd.f32 %v1234_v4, %v1233_v28 }
 0x22d   : > { %v1236_v12 = vrot.slane %v1235_v40, 2 }
 0x22f   : > { %v1237_v62 = vadd.f32 %v1236_v12, %v1235_v40 }
 0x231   : > { %v1238_v36 = vrot.slane %v1237_v62, 1 }
 0x233   : > { %v1239_v8 = vadd.f32 %v1238_v36, %v1237_v62 }
 0x235   : > { %v1240_v2 = vadd.f32 %v1239_v8, %v1106_v16 }
 0x237   : > { %1241 = vst [vmem:[#allocation3] sm:$0x1] %v1240_v2 }
 0x238 PF: > { %p2070_p6 = scmp.ne.s32.totalorder %s2581_s15, 1 }
 0x239   : > { %v1246_v44 = vld [vmem:[#allocation2] sm:$0x1] (!%p2070_p6)  ;;  %v1261_v21 = vlaneseq (!%p2070_p6)  ;;  %v3611_v4 = vld [vmem:[#allocation4_spill] sm:$0xff] (!%p2070_p6)  ;;  %v3612_v12 = vld [vmem:[#allocation5_spill] sm:$0xff] (!%p2070_p6) }
 0x23a   : > { %1245 = sbr.rel (%p2070_p6) target bundleno = 693 (0x2b5), region = 48  ;;  %v1247_v54 = vmul.f32 (!%p2070_p6), 0.001953125, %v1246_v44  ;;  %v1253_v32 = vld [vmem:[%s3544_s2] sm:$0x1] (!%p2070_p6)  ;;  %v3613_v36 = vld [vmem:[#allocation6_spill] sm:$0xff] (!%p2070_p6) }
 0x23b   : > { %v1262_v25 = vshrl.u32 (!%p2070_p6), %v1261_v21, 7  ;;  %v1257_v20 = vld [vmem:[%s3545_s3] sm:$0x1] (!%p2070_p6) }
 0x23c   : > { %v1250_v6 = vmul.f32 (!%p2070_p6), %v1247_v54, %v1247_v54 }
 0x23d   : > { %v1263_v14 = vsub.s32 (!%p2070_p6), 0, %v1262_v25 }
 0x23e   : > { %v1248_v56 = vld [vmem:[#allocation3] sm:$0x1] (!%p2070_p6) }
 0x23f   : > { %v1249_v17 = vmul.f32 (!%p2070_p6), 0.001953125, %v1248_v56 }
 0x241   : > { %v1251_v48 = vsub.f32 %v1249_v17, %v1250_v6 }
 0x243   : > { %v1252_v60 = vmax.f32 %v1251_v48, 0.0 }
 0x245   : > { %v1254_v10 = vadd.f32 1e-05, %v1252_v60 }
 0x247   : > { %2565 = vrsqrt.f32 %v1254_v10 }
 0x251   : > { %v2566_v52 = vpop.eup %2565 }
 0x252   : > { %v1256_v24 = vmul.f32 %v2566_v52, %v1253_v32 }
 0x254   : > { %v1258_v0 = vmul.f32 %v1256_v24, %v1247_v54  ;;  %v3241_v58 = vrot.slane %v1256_v24, %v1263_v14 }
 0x256   : > { %v1259_v28 = vsub.f32 %v1257_v20, %v1258_v0  ;;  %v1266_v40 = vmul.f32 %v3241_v58, %v3611_v4  ;;  %v1267_v62 = vmul.f32 %v3241_v58, %v3612_v12  ;;  %v1268_v16 = vmul.f32 %v3241_v58, %v3613_v36 }
 0x257   : > { %v1269_v8 = vmul.f32 %v3241_v58, %v2923_v29  ;;  %v1270_v2 = vmul.f32 %v3241_v58, %v2927_v33  ;;  %v1271_v44 = vmul.f32 %v3241_v58, %v2931_v37  ;;  %v1272_v56 = vmul.f32 %v3241_v58, %v2935_v41 }
 0x258   : > { %v3257_v54 = vrot.slane %v1259_v28, %v1263_v14  ;;  %v1273_v17 = vmul.f32 %v3241_v58, %v2939_v45  ;;  %v1274_v6 = vmul.f32 %v3241_v58, %v2943_v49  ;;  %v1275_v29 = vmul.f32 %v3241_v58, %v2947_v53 }
 0x259   : > { %v1276_v33 = vmul.f32 %v3241_v58, %v2951_v57  ;;  %v1277_v37 = vmul.f32 %v3241_v58, %v2955_v61  ;;  %v1278_v41 = vmul.f32 %v3241_v58, %v2959_v1  ;;  %v1279_v48 = vmul.f32 %v3241_v58, %v2963_v5 }
 0x25a   : > { %v1336_v45 = vadd.f32 %v3257_v54, %v1266_v40  ;;  %v1337_v60 = vadd.f32 %v3257_v54, %v1267_v62  ;;  %v1338_v49 = vadd.f32 %v3257_v54, %v1268_v16  ;;  %v1339_v53 = vadd.f32 %v3257_v54, %v1269_v8 }
 0x25b   : > { %v1340_v10 = vadd.f32 %v3257_v54, %v1270_v2  ;;  %v1341_v57 = vadd.f32 %v3257_v54, %v1271_v44  ;;  %v1342_v61 = vadd.f32 %v3257_v54, %v1272_v56  ;;  %v1343_v21 = vadd.f32 %v3257_v54, %v1273_v17 }
 0x25c   : > { %vm1400_vm0 = vcmp.ge.f32.partialorder %v1336_v45, 0.0  ;;  %vm1401_vm1 = vcmp.ge.f32.partialorder %v1337_v60, 0.0  ;;  %v1464_v1 = vmul.f32 0.2, %v1336_v45  ;;  %v1465_v5 = vmul.f32 0.2, %v1337_v60 }
 0x25d   : > { %vm1402_vm2 = vcmp.ge.f32.partialorder %v1338_v49, 0.0  ;;  %vm1403_vm3 = vcmp.ge.f32.partialorder %v1339_v53, 0.0  ;;  %v1466_v25 = vmul.f32 0.2, %v1338_v49  ;;  %v1467_v32 = vmul.f32 0.2, %v1339_v53 }
 0x25e   : > { %v1528_v14 = vsel %vm1400_vm0, %v1336_v45, %v1464_v1  ;;  %v1529_v52 = vsel %vm1401_vm1, %v1337_v60, %v1465_v5  ;;  %vm1404_vm4 = vcmp.ge.f32.partialorder %v1340_v10, 0.0  ;;  %vm1405_vm5 = vcmp.ge.f32.partialorder %v1341_v57, 0.0 }
 0x25f   : > { %v2207_v24 = vpack.c.bf16 %v1529_v52, %v1528_v14  ;;  %v1530_v20 = vsel %vm1402_vm2, %v1338_v49, %v1466_v25  ;;  %v1531_v0 = vsel %vm1403_vm3, %v1339_v53, %v1467_v32  ;;  %v1468_v28 = vmul.f32 0.2, %v1340_v10 }
 0x260   : > { %v2212_v4 = vpack.c.bf16 %v1531_v0, %v1530_v20  ;;  %v1469_v40 = vmul.f32 0.2, %v1341_v57  ;;  %vm1406_vm6 = vcmp.ge.f32.partialorder %v1342_v61, 0.0  ;;  %vm1407_vm7 = vcmp.ge.f32.partialorder %v1343_v21, 0.0 }
 0x261   : > { %2208 = vst [vmem:[%s3546_s4] sm:$0xff] %v2207_v24   ;;  %v1532_v12 = vsel %vm1404_vm4, %v1340_v10, %v1468_v28  ;;  %v1470_v62 = vmul.f32 0.2, %v1342_v61  ;;  %v1471_v36 = vmul.f32 0.2, %v1343_v21  ;;  %v1344_v16 = vadd.f32 %v3257_v54, %v1274_v6 }
 0x262   : > { %2364 = vst [vmem:[%s3546_s4 + $0x8] sm:$0xff] %v2212_v4   ;;  %v1533_v8 = vsel %vm1405_vm5, %v1341_v57, %v1469_v40  ;;  %v1345_v2 = vadd.f32 %v3257_v54, %v1275_v29  ;;  %v1346_v44 = vadd.f32 %v3257_v54, %v1276_v33  ;;  %v1347_v56 = vadd.f32 %v3257_v54, %v1277_v37 }
 0x263   : > { %v2217_v17 = vpack.c.bf16 %v1533_v8, %v1532_v12  ;;  %v1534_v45 = vsel %vm1406_vm6, %v1342_v61, %v1470_v62  ;;  %v1535_v60 = vsel %vm1407_vm7, %v1343_v21, %v1471_v36  ;;  %vm1408_vm8 = vcmp.ge.f32.partialorder %v1344_v16, 0.0 }
 0x264   : > { %v2222_v49 = vpack.c.bf16 %v1535_v60, %v1534_v45  ;;  %vm1409_vm9 = vcmp.ge.f32.partialorder %v1345_v2, 0.0  ;;  %v1472_v53 = vmul.f32 0.2, %v1344_v16  ;;  %v1473_v10 = vmul.f32 0.2, %v1345_v2 }
 0x265   : > { %2365 = vst [vmem:[%s3546_s4 + $0x10] sm:$0xff] %v2217_v17   ;;  %vm1410_vm10 = vcmp.ge.f32.partialorder %v1346_v44, 0.0  ;;  %vm1411_vm11 = vcmp.ge.f32.partialorder %v1347_v56, 0.0  ;;  %v1474_v6 = vmul.f32 0.2, %v1346_v44  ;;  %v1348_v57 = vadd.f32 %v3257_v54, %v1278_v41 }
 0x266   : > { %v1475_v29 = vmul.f32 0.2, %v1347_v56  ;;  %2366 = vst [vmem:[%s3546_s4 + $0x18] sm:$0xff] %v2222_v49   ;;  %v1536_v33 = vsel %vm1408_vm8, %v1344_v16, %v1472_v53  ;;  %v1537_v37 = vsel %vm1409_vm9, %v1345_v2, %v1473_v10  ;;  %v1349_v61 = vadd.f32 %v3257_v54, %v1279_v48 }
 0x267   : > { %v2227_v21 = vpack.c.bf16 %v1537_v37, %v1536_v33  ;;  %v1538_v1 = vsel %vm1410_vm10, %v1346_v44, %v1474_v6  ;;  %v1280_v25 = vmul.f32 %v3241_v58, %v2967_v9  ;;  %vm1412_vm12 = vcmp.ge.f32.partialorder %v1348_v57, 0.0 }
 0x268   : > { %v1539_v5 = vsel %vm1411_vm11, %v1347_v56, %v1475_v29  ;;  %vm1413_vm13 = vcmp.ge.f32.partialorder %v1349_v61, 0.0  ;;  %v1476_v14 = vmul.f32 0.2, %v1348_v57  ;;  %v1477_v52 = vmul.f32 0.2, %v1349_v61 }
 0x269   : > { %v2232_v32 = vpack.c.bf16 %v1539_v5, %v1538_v1  ;;  %2367 = vst [vmem:[%s3546_s4 + $0x20] sm:$0xff] %v2227_v21   ;;  %v1281_v41 = vmul.f32 %v3241_v58, %v2971_v13  ;;  %v1350_v48 = vadd.f32 %v3257_v54, %v1280_v25  ;;  %v1282_v24 = vmul.f32 %v3241_v58, %v2975_v19 }
 0x26a   : > { %v1540_v9 = vsel %vm1412_vm12, %v1348_v57, %v1476_v14  ;;  %v1283_v20 = vmul.f32 %v3241_v58, %v2979_v27  ;;  %v1284_v0 = vmul.f32 %v3241_v58, %v2983_v35  ;;  %v1285_v28 = vmul.f32 %v3241_v58, %v2987_v43 }
 0x26b   : > { %2368 = vst [vmem:[%s3546_s4 + $0x28] sm:$0xff] %v2232_v32   ;;  %v1541_v13 = vsel %vm1413_vm13, %v1349_v61, %v1477_v52  ;;  %v1351_v4 = vadd.f32 %v3257_v54, %v1281_v41  ;;  %vm1414_vm14 = vcmp.ge.f32.partialorder %v1350_v48, 0.0  ;;  %v1478_v40 = vmul.f32 0.2, %v1350_v48 }
 0x26c   : > { %v2237_v19 = vpack.c.bf16 %v1541_v13, %v1540_v9  ;;  %v1352_v12 = vadd.f32 %v3257_v54, %v1282_v24  ;;  %v1353_v62 = vadd.f32 %v3257_v54, %v1283_v20  ;;  %v1354_v36 = vadd.f32 %v3257_v54, %v1284_v0 }
 0x26d   : > { %vm1415_vm15 = vcmp.ge.f32.partialorder %v1351_v4, 0.0  ;;  %v1479_v27 = vmul.f32 0.2, %v1351_v4  ;;  %v1542_v16 = vsel %vm1414_vm14, %v1350_v48, %v1478_v40  ;;  %v1355_v35 = vadd.f32 %v3257_v54, %v1285_v28 }
 0x26e   : > { %2369 = vst [vmem:[%s3546_s4 + $0x30] sm:$0xff] %v2237_v19   ;;  %vm1416_vm0 = vcmp.ge.f32.partialorder %v1352_v12, 0.0  ;;  %vm1417_vm1 = vcmp.ge.f32.partialorder %v1353_v62, 0.0  ;;  %v1480_v43 = vmul.f32 0.2, %v1352_v12  ;;  %vm1418_vm2 = vcmp.ge.f32.partialorder %v1354_v36, 0.0 }
 0x26f   : > { %v1481_v8 = vmul.f32 0.2, %v1353_v62  ;;  %v1543_v2 = vsel %vm1415_vm15, %v1351_v4, %v1479_v27  ;;  %vm1419_vm3 = vcmp.ge.f32.partialorder %v1355_v35, 0.0  ;;  %v1482_v44 = vmul.f32 0.2, %v1354_v36 }
 0x270   : > { %v2242_v56 = vpack.c.bf16 %v1543_v2, %v1542_v16  ;;  %v1544_v17 = vsel %vm1416_vm0, %v1352_v12, %v1480_v43  ;;  %v1483_v60 = vmul.f32 0.2, %v1355_v35  ;;  %v1286_v10 = vmul.f32 %v3241_v58, %v2991_v51 }
 0x271   : > { %v1545_v45 = vsel %vm1417_vm1, %v1353_v62, %v1481_v8  ;;  %v1546_v53 = vsel %vm1418_vm2, %v1354_v36, %v1482_v44  ;;  %v1287_v6 = vmul.f32 %v3241_v58, %v2995_v59  ;;  %v1288_v33 = vmul.f32 %v3241_v58, %v2999_v3 }
 0x272   : > { %v2247_v49 = vpack.c.bf16 %v1545_v45, %v1544_v17  ;;  %2370 = vst [vmem:[%s3546_s4 + $0x38] sm:$0xff] %v2242_v56   ;;  %v1547_v29 = vsel %vm1419_vm3, %v1355_v35, %v1483_v60  ;;  %v1289_v37 = vmul.f32 %v3241_v58, %v3003_v11  ;;  %v1290_v57 = vmul.f32 %v3241_v58, %v3007_v23 }
 0x273   : > { %v2252_v51 = vpack.c.bf16 %v1547_v29, %v1546_v53  ;;  %v1356_v59 = vadd.f32 %v3257_v54, %v1286_v10  ;;  %v1357_v61 = vadd.f32 %v3257_v54, %v1287_v6  ;;  %v1291_v21 = vmul.f32 %v3241_v58, %v3011_v39 }
 0x274   : > { %2371 = vst [vmem:[%s3546_s4 + $0x40] sm:$0xff] %v2247_v49   ;;  %v1358_v3 = vadd.f32 %v3257_v54, %v1288_v33  ;;  %v1359_v1 = vadd.f32 %v3257_v54, %v1289_v37  ;;  %v1360_v11 = vadd.f32 %v3257_v54, %v1290_v57  ;;  %v1292_v23 = vmul.f32 %v3241_v58, %v3015_v55 }
 0x275   : > { %2372 = vst [vmem:[%s3546_s4 + $0x48] sm:$0xff] %v2252_v51   ;;  %vm1420_vm4 = vcmp.ge.f32.partialorder %v1356_v59, 0.0  ;;  %vm1421_vm5 = vcmp.ge.f32.partialorder %v1357_v61, 0.0  ;;  %v1484_v5 = vmul.f32 0.2, %v1356_v59  ;;  %v1361_v41 = vadd.f32 %v3257_v54, %v1291_v21 }
 0x276   : > { %v1485_v25 = vmul.f32 0.2, %v1357_v61  ;;  %vm1422_vm6 = vcmp.ge.f32.partialorder %v1358_v3, 0.0  ;;  %vm1423_vm7 = vcmp.ge.f32.partialorder %v1359_v1, 0.0  ;;  %v1486_v39 = vmul.f32 0.2, %v1358_v3 }
 0x277   : > { %v1487_v32 = vmul.f32 0.2, %v1359_v1  ;;  %v1548_v14 = vsel %vm1420_vm4, %v1356_v59, %v1484_v5  ;;  %vm1424_vm8 = vcmp.ge.f32.partialorder %v1360_v11, 0.0  ;;  %v1488_v9 = vmul.f32 0.2, %v1360_v11 }
 0x278   : > { %v1549_v52 = vsel %vm1421_vm5, %v1357_v61, %v1485_v25  ;;  %v1550_v24 = vsel %vm1422_vm6, %v1358_v3, %v1486_v39  ;;  %vm1425_vm9 = vcmp.ge.f32.partialorder %v1361_v41, 0.0  ;;  %v1489_v0 = vmul.f32 0.2, %v1361_v41 }
 0x279   : > { %v2257_v48 = vpack.c.bf16 %v1549_v52, %v1548_v14  ;;  %v1551_v55 = vsel %vm1423_vm7, %v1359_v1, %v1487_v32  ;;  %v1293_v28 = vmul.f32 %v3241_v58, %v3019_v7  ;;  %v1552_v13 = vsel %vm1424_vm8, %v1360_v11, %v1488_v9 }
 0x27a   : > { %v2262_v20 = vpack.c.bf16 %v1551_v55, %v1550_v24  ;;  %v1362_v4 = vadd.f32 %v3257_v54, %v1292_v23  ;;  %v1294_v40 = vmul.f32 %v3241_v58, %v3023_v31  ;;  %v1295_v19 = vmul.f32 %v3241_v58, %v3027_v47 }
 0x27b   : > { %2373 = vst [vmem:[%s3546_s4 + $0x50] sm:$0xff] %v2257_v48   ;;  %v1553_v12 = vsel %vm1425_vm9, %v1361_v41, %v1489_v0  ;;  %v1363_v7 = vadd.f32 %v3257_v54, %v1293_v28  ;;  %v1296_v62 = vmul.f32 %v3241_v58, %v3031_v63  ;;  %v1297_v36 = vmul.f32 %v3241_v58, %v3035_v15  ;;  %v3615_v28 = vld [vmem:[#allocation8_spill] sm:$0xff] }
 0x27c   : > { %2374 = vst [vmem:[%s3546_s4 + $0x58] sm:$0xff] %v2262_v20   ;;  %v2267_v27 = vpack.c.bf16 %v1553_v12, %v1552_v13  ;;  %vm1426_vm10 = vcmp.ge.f32.partialorder %v1362_v4, 0.0  ;;  %v1490_v16 = vmul.f32 0.2, %v1362_v4  ;;  %v1364_v31 = vadd.f32 %v3257_v54, %v1294_v40  ;;  %v3614_v20 = vld [vmem:[#allocation7_spill] sm:$0xff] }
 0x27d   : > { %vm1427_vm11 = vcmp.ge.f32.partialorder %v1363_v7, 0.0  ;;  %v1491_v47 = vmul.f32 0.2, %v1363_v7  ;;  %v1365_v35 = vadd.f32 %v3257_v54, %v1295_v19  ;;  %v1366_v43 = vadd.f32 %v3257_v54, %v1296_v62 }
 0x27e   : > { %2375 = vst [vmem:[%s3546_s4 + $0x60] sm:$0xff] %v2267_v27   ;;  %v1554_v8 = vsel %vm1426_vm10, %v1362_v4, %v1490_v16  ;;  %vm1428_vm12 = vcmp.ge.f32.partialorder %v1364_v31, 0.0  ;;  %v1492_v63 = vmul.f32 0.2, %v1364_v31  ;;  %v1367_v15 = vadd.f32 %v3257_v54, %v1297_v36  ;;  %v3616_v4 = vld [vmem:[#allocation9_spill] sm:$0xff] }
 0x27f   : > { %v1555_v2 = vsel %vm1427_vm11, %v1363_v7, %v1491_v47  ;;  %vm1429_vm13 = vcmp.ge.f32.partialorder %v1365_v35, 0.0  ;;  %v1493_v44 = vmul.f32 0.2, %v1365_v35  ;;  %vm1430_vm14 = vcmp.ge.f32.partialorder %v1366_v43, 0.0 }
 0x280   : > { %v2272_v56 = vpack.c.bf16 %v1555_v2, %v1554_v8  ;;  %v1556_v17 = vsel %vm1428_vm12, %v1364_v31, %v1492_v63  ;;  %vm1431_vm15 = vcmp.ge.f32.partialorder %v1367_v15, 0.0  ;;  %v1494_v45 = vmul.f32 0.2, %v1366_v43 }
 0x281   : > { %v1557_v60 = vsel %vm1429_vm13, %v1365_v35, %v1493_v44  ;;  %v1495_v49 = vmul.f32 0.2, %v1367_v15  ;;  %v1298_v53 = vmul.f32 %v3241_v58, %v2913_v18  ;;  %v1299_v10 = vmul.f32 %v3241_v58, %v2917_v22 }
 0x282   : > { %2376 = vst [vmem:[%s3546_s4 + $0x68] sm:$0xff] %v2272_v56   ;;  %v2277_v6 = vpack.c.bf16 %v1557_v60, %v1556_v17  ;;  %v1558_v29 = vsel %vm1430_vm14, %v1366_v43, %v1494_v45  ;;  %v1300_v33 = vmul.f32 %v3241_v58, %v2921_v26  ;;  %v1301_v37 = vmul.f32 %v3241_v58, %v2925_v30  ;;  %v3617_v45 = vld [vmem:[#allocation10_spill] sm:$0xff] }
 0x283   : > { %v1559_v57 = vsel %vm1431_vm15, %v1367_v15, %v1495_v49  ;;  %v1368_v51 = vadd.f32 %v3257_v54, %v1298_v53  ;;  %v1369_v18 = vadd.f32 %v3257_v54, %v1299_v10  ;;  %v1302_v22 = vmul.f32 %v3241_v58, %v2929_v34  ;;  %v3618_v49 = vld [vmem:[#allocation11_spill] sm:$0xff] }
 0x284   : > { %2377 = vst [vmem:[%s3546_s4 + $0x70] sm:$0xff] %v2277_v6   ;;  %v2282_v59 = vpack.c.bf16 %v1559_v57, %v1558_v29  ;;  %v1370_v61 = vadd.f32 %v3257_v54, %v1300_v33  ;;  %v1371_v26 = vadd.f32 %v3257_v54, %v1301_v37  ;;  %v1303_v30 = vmul.f32 %v3241_v58, %v2933_v38  ;;  %v3619_v6 = vld [vmem:[#allocation12_spill] sm:$0xff]  ;;  %v3620_v33 = vld [vmem:[#allocation13_spill] sm:$0xff]  ;;  %v3621_v57 = vld [vmem:[#allocation14_spill] sm:$0xff] }
 0x285   : > { %vm1432_vm0 = vcmp.ge.f32.partialorder %v1368_v51, 0.0  ;;  %vm1433_vm1 = vcmp.ge.f32.partialorder %v1369_v18, 0.0  ;;  %v1496_v21 = vmul.f32 0.2, %v1368_v51  ;;  %v1497_v3 = vmul.f32 0.2, %v1369_v18 }
 0x286   : > { %2378 = vst [vmem:[%s3546_s4 + $0x78] sm:$0xff] %v2282_v59   ;;  %vm1434_vm2 = vcmp.ge.f32.partialorder %v1370_v61, 0.0  ;;  %vm1435_vm3 = vcmp.ge.f32.partialorder %v1371_v26, 0.0  ;;  %v1498_v34 = vmul.f32 0.2, %v1370_v61  ;;  %v1372_v5 = vadd.f32 %v3257_v54, %v1302_v22 }
 0x287   : > { %v1499_v1 = vmul.f32 0.2, %v1371_v26  ;;  %v1560_v11 = vsel %vm1432_vm0, %v1368_v51, %v1496_v21  ;;  %v1561_v23 = vsel %vm1433_vm1, %v1369_v18, %v1497_v3  ;;  %v1373_v25 = vadd.f32 %v3257_v54, %v1303_v30 }
 0x288   : > { %v2287_v39 = vpack.c.bf16 %v1561_v23, %v1560_v11  ;;  %v1562_v38 = vsel %vm1434_vm2, %v1370_v61, %v1498_v34  ;;  %v1304_v14 = vmul.f32 %v3241_v58, %v2937_v42  ;;  %vm1436_vm4 = vcmp.ge.f32.partialorder %v1372_v5, 0.0  ;;  %v3622_v61 = vld [vmem:[#allocation15_spill] sm:$0xff]  ;;  %v3623_v34 = vld [vmem:[#allocation16_spill] sm:$0xff] }
 0x289   : > { %v1563_v32 = vsel %vm1435_vm3, %v1371_v26, %v1499_v1  ;;  %vm1437_vm5 = vcmp.ge.f32.partialorder %v1373_v25, 0.0  ;;  %v1500_v41 = vmul.f32 0.2, %v1372_v5  ;;  %v1501_v48 = vmul.f32 0.2, %v1373_v25 }
 0x28a   : > { %v2292_v52 = vpack.c.bf16 %v1563_v32, %v1562_v38  ;;  %2379 = vst [vmem:[%s3546_s4 + $0x80] sm:$0xff] %v2287_v39   ;;  %v1305_v24 = vmul.f32 %v3241_v58, %v2941_v46  ;;  %v1374_v55 = vadd.f32 %v3257_v54, %v1304_v14  ;;  %v1306_v9 = vmul.f32 %v3241_v58, %v2945_v50 }
 0x28b   : > { %v1564_v42 = vsel %vm1436_vm4, %v1372_v5, %v1500_v41  ;;  %v1307_v0 = vmul.f32 %v3241_v58, %v3614_v20  ;;  %v1308_v13 = vmul.f32 %v3241_v58, %v3615_v28  ;;  %v1309_v40 = vmul.f32 %v3241_v58, %v3616_v4  ;;  %v3625_v28 = vld [vmem:[#allocation18_spill] sm:$0xff]  ;;  %v3626_v4 = vld [vmem:[#allocation19_spill] sm:$0xff] }
 0x28c   : > { %2380 = vst [vmem:[%s3546_s4 + $0x88] sm:$0xff] %v2292_v52   ;;  %v1565_v46 = vsel %vm1437_vm5, %v1373_v25, %v1501_v48  ;;  %v1375_v19 = vadd.f32 %v3257_v54, %v1305_v24  ;;  %vm1438_vm6 = vcmp.ge.f32.partialorder %v1374_v55, 0.0  ;;  %v1502_v12 = vmul.f32 0.2, %v1374_v55 }
 0x28d   : > { %v2297_v50 = vpack.c.bf16 %v1565_v46, %v1564_v42  ;;  %v1376_v7 = vadd.f32 %v3257_v54, %v1306_v9  ;;  %v1377_v62 = vadd.f32 %v3257_v54, %v1307_v0  ;;  %v1378_v36 = vadd.f32 %v3257_v54, %v1308_v13  ;;  %v3624_v9 = vld [vmem:[#allocation17_spill] sm:$0xff] }
 0x28e   : > { %vm1439_vm7 = vcmp.ge.f32.partialorder %v1375_v19, 0.0  ;;  %v1503_v27 = vmul.f32 0.2, %v1375_v19  ;;  %v1566_v16 = vsel %vm1438_vm6, %v1374_v55, %v1502_v12  ;;  %v1379_v31 = vadd.f32 %v3257_v54, %v1309_v40  ;;  %v3627_v12 = vld [vmem:[#allocation20_spill] sm:$0xff] }
 0x28f   : > { %2381 = vst [vmem:[%s3546_s4 + $0x90] sm:$0xff] %v2297_v50   ;;  %vm1440_vm8 = vcmp.ge.f32.partialorder %v1376_v7, 0.0  ;;  %vm1441_vm9 = vcmp.ge.f32.partialorder %v1377_v62, 0.0  ;;  %v1504_v47 = vmul.f32 0.2, %v1376_v7  ;;  %vm1442_vm10 = vcmp.ge.f32.partialorder %v1378_v36, 0.0 }
 0x290   : > { %v1505_v35 = vmul.f32 0.2, %v1377_v62  ;;  %v1567_v43 = vsel %vm1439_vm7, %v1375_v19, %v1503_v27  ;;  %vm1443_vm11 = vcmp.ge.f32.partialorder %v1379_v31, 0.0  ;;  %v1506_v8 = vmul.f32 0.2, %v1378_v36 }
 0x291   : > { %v2302_v63 = vpack.c.bf16 %v1567_v43, %v1566_v16  ;;  %v1568_v15 = vsel %vm1440_vm8, %v1376_v7, %v1504_v47  ;;  %v1507_v44 = vmul.f32 0.2, %v1379_v31  ;;  %v1310_v60 = vmul.f32 %v3241_v58, %v3617_v45  ;;  %v3628_v7 = vld [vmem:[#allocation21_spill] sm:$0xff] }
 0x292   : > { %v1569_v2 = vsel %vm1441_vm9, %v1377_v62, %v1505_v35  ;;  %v1570_v17 = vsel %vm1442_vm10, %v1378_v36, %v1506_v8  ;;  %v1311_v53 = vmul.f32 %v3241_v58, %v3618_v49  ;;  %v1312_v29 = vmul.f32 %v3241_v58, %v3619_v6  ;;  %v3629_v49 = vld [vmem:[#allocation22_spill] sm:$0xff] }
 0x293   : > { %v2307_v56 = vpack.c.bf16 %v1569_v2, %v1568_v15  ;;  %2382 = vst [vmem:[%s3546_s4 + $0x98] sm:$0xff] %v2302_v63   ;;  %v1571_v10 = vsel %vm1443_vm11, %v1379_v31, %v1507_v44  ;;  %v1313_v37 = vmul.f32 %v3241_v58, %v3620_v33  ;;  %v1314_v51 = vmul.f32 %v3241_v58, %v3621_v57 }
 0x294   : > { %v2312_v18 = vpack.c.bf16 %v1571_v10, %v1570_v17  ;;  %v1380_v22 = vadd.f32 %v3257_v54, %v1310_v60  ;;  %v1381_v59 = vadd.f32 %v3257_v54, %v1311_v53  ;;  %v1315_v26 = vmul.f32 %v3241_v58, %v3622_v61  ;;  %v3630_v10 = vld [vmem:[#allocation23_spill] sm:$0xff] }
 0x295   : > { %2383 = vst [vmem:[%s3546_s4 + $0xa0] sm:$0xff] %v2307_v56   ;;  %v1382_v30 = vadd.f32 %v3257_v54, %v1312_v29  ;;  %v1383_v21 = vadd.f32 %v3257_v54, %v1313_v37  ;;  %v1384_v3 = vadd.f32 %v3257_v54, %v1314_v51  ;;  %v1316_v1 = vmul.f32 %v3241_v58, %v3623_v34  ;;  %v3631_v37 = vld [vmem:[#allocation24_spill] sm:$0xff]  ;;  %v3632_v51 = vld [vmem:[#allocation25_spill] sm:$0xff] }
 0x296   : > { %2384 = vst [vmem:[%s3546_s4 + $0xa8] sm:$0xff] %v2312_v18   ;;  %vm1444_vm12 = vcmp.ge.f32.partialorder %v1380_v22, 0.0  ;;  %vm1445_vm13 = vcmp.ge.f32.partialorder %v1381_v59, 0.0  ;;  %v1508_v11 = vmul.f32 0.2, %v1380_v22  ;;  %v1385_v32 = vadd.f32 %v3257_v54, %v1315_v26  ;;  %v3633_v26 = vld [vmem:[#allocation26_spill] sm:$0xff] }
 0x297   : > { %v1509_v23 = vmul.f32 0.2, %v1381_v59  ;;  %vm1446_vm14 = vcmp.ge.f32.partialorder %v1382_v30, 0.0  ;;  %vm1447_vm15 = vcmp.ge.f32.partialorder %v1383_v21, 0.0  ;;  %v1510_v5 = vmul.f32 0.2, %v1382_v30 }
 0x298   : > { %v1511_v25 = vmul.f32 0.2, %v1383_v21  ;;  %v1572_v39 = vsel %vm1444_vm12, %v1380_v22, %v1508_v11  ;;  %vm1448_vm0 = vcmp.ge.f32.partialorder %v1384_v3, 0.0  ;;  %v1512_v48 = vmul.f32 0.2, %v1384_v3 }
 0x299   : > { %v1573_v38 = vsel %vm1445_vm13, %v1381_v59, %v1509_v23  ;;  %v1574_v52 = vsel %vm1446_vm14, %v1382_v30, %v1510_v5  ;;  %vm1449_vm1 = vcmp.ge.f32.partialorder %v1385_v32, 0.0  ;;  %v1513_v55 = vmul.f32 0.2, %v1385_v32 }
 0x29a   : > { %v2317_v14 = vpack.c.bf16 %v1573_v38, %v1572_v39  ;;  %v1575_v41 = vsel %vm1447_vm15, %v1383_v21, %v1511_v25  ;;  %v1317_v42 = vmul.f32 %v3241_v58, %v3624_v9  ;;  %v1576_v20 = vsel %vm1448_vm0, %v1384_v3, %v1512_v48 }
 0x29b   : > { %v2322_v24 = vpack.c.bf16 %v1575_v41, %v1574_v52  ;;  %v1386_v0 = vadd.f32 %v3257_v54, %v1316_v1  ;;  %v1318_v13 = vmul.f32 %v3241_v58, %v3625_v28  ;;  %v1319_v40 = vmul.f32 %v3241_v58, %v3626_v4  ;;  %v3634_v1 = vld [vmem:[#allocation27_spill] sm:$0xff]  ;;  %v3636_v28 = vld [vmem:[#allocation29_spill] sm:$0xff] }
 0x29c   : > { %2385 = vst [vmem:[%s3546_s4 + $0xb0] sm:$0xff] %v2317_v14   ;;  %v1577_v46 = vsel %vm1449_vm1, %v1385_v32, %v1513_v55  ;;  %v1387_v19 = vadd.f32 %v3257_v54, %v1317_v42  ;;  %v1320_v50 = vmul.f32 %v3241_v58, %v3627_v12  ;;  %v1321_v62 = vmul.f32 %v3241_v58, %v3628_v7  ;;  %v3635_v55 = vld [vmem:[#allocation28_spill] sm:$0xff] }
 0x29d   : > { %2386 = vst [vmem:[%s3546_s4 + $0xb8] sm:$0xff] %v2322_v24   ;;  %v2327_v36 = vpack.c.bf16 %v1577_v46, %v1576_v20  ;;  %vm1450_vm2 = vcmp.ge.f32.partialorder %v1386_v0, 0.0  ;;  %v1514_v27 = vmul.f32 0.2, %v1386_v0  ;;  %v1388_v16 = vadd.f32 %v3257_v54, %v1318_v13 }
 0x29e   : > { %vm1451_vm3 = vcmp.ge.f32.partialorder %v1387_v19, 0.0  ;;  %v1515_v31 = vmul.f32 0.2, %v1387_v19  ;;  %v1389_v47 = vadd.f32 %v3257_v54, %v1319_v40  ;;  %v1390_v35 = vadd.f32 %v3257_v54, %v1320_v50 }
 0x29f   : > { %2387 = vst [vmem:[%s3546_s4 + $0xc0] sm:$0xff] %v2327_v36   ;;  %v1578_v43 = vsel %vm1450_vm2, %v1386_v0, %v1514_v27  ;;  %vm1452_vm4 = vcmp.ge.f32.partialorder %v1388_v16, 0.0  ;;  %v1516_v8 = vmul.f32 0.2, %v1388_v16  ;;  %v1391_v63 = vadd.f32 %v3257_v54, %v1321_v62 }
 0x2a0   : > { %v1579_v15 = vsel %vm1451_vm3, %v1387_v19, %v1515_v31  ;;  %vm1453_vm5 = vcmp.ge.f32.partialorder %v1389_v47, 0.0  ;;  %v1517_v2 = vmul.f32 0.2, %v1389_v47  ;;  %vm1454_vm6 = vcmp.ge.f32.partialorder %v1390_v35, 0.0 }
 0x2a1   : > { %v2332_v44 = vpack.c.bf16 %v1579_v15, %v1578_v43  ;;  %v1580_v56 = vsel %vm1452_vm4, %v1388_v16, %v1516_v8  ;;  %vm1455_vm7 = vcmp.ge.f32.partialorder %v1391_v63, 0.0  ;;  %v1518_v17 = vmul.f32 0.2, %v1390_v35 }
 0x2a2   : > { %v1581_v45 = vsel %vm1453_vm5, %v1389_v47, %v1517_v2  ;;  %v1519_v60 = vmul.f32 0.2, %v1391_v63  ;;  %v1322_v53 = vmul.f32 %v3241_v58, %v3629_v49  ;;  %v1323_v6 = vmul.f32 %v3241_v58, %v3630_v10 }
 0x2a3   : > { %2388 = vst [vmem:[%s3546_s4 + $0xc8] sm:$0xff] %v2332_v44   ;;  %v2337_v29 = vpack.c.bf16 %v1581_v45, %v1580_v56  ;;  %v1582_v33 = vsel %vm1454_vm6, %v1390_v35, %v1518_v17  ;;  %v1324_v57 = vmul.f32 %v3241_v58, %v3631_v37  ;;  %v1325_v18 = vmul.f32 %v3241_v58, %v3632_v51 }
 0x2a4   : > { %v1583_v22 = vsel %vm1455_vm7, %v1391_v63, %v1519_v60  ;;  %v1392_v59 = vadd.f32 %v3257_v54, %v1322_v53  ;;  %v1393_v61 = vadd.f32 %v3257_v54, %v1323_v6  ;;  %v1326_v30 = vmul.f32 %v3241_v58, %v3633_v26 }
 0x2a5   : > { %2389 = vst [vmem:[%s3546_s4 + $0xd0] sm:$0xff] %v2337_v29   ;;  %v2342_v21 = vpack.c.bf16 %v1583_v22, %v1582_v33  ;;  %v1394_v3 = vadd.f32 %v3257_v54, %v1324_v57  ;;  %v1395_v34 = vadd.f32 %v3257_v54, %v1325_v18  ;;  %v1327_v11 = vmul.f32 %v3241_v58, %v3634_v1 }
 0x2a6   : > { %vm1456_vm8 = vcmp.ge.f32.partialorder %v1392_v59, 0.0  ;;  %vm1457_vm9 = vcmp.ge.f32.partialorder %v1393_v61, 0.0  ;;  %v1520_v23 = vmul.f32 0.2, %v1392_v59  ;;  %v1521_v5 = vmul.f32 0.2, %v1393_v61 }
 0x2a7   : > { %2390 = vst [vmem:[%s3546_s4 + $0xd8] sm:$0xff] %v2342_v21   ;;  %vm1458_vm10 = vcmp.ge.f32.partialorder %v1394_v3, 0.0  ;;  %vm1459_vm11 = vcmp.ge.f32.partialorder %v1395_v34, 0.0  ;;  %v1522_v25 = vmul.f32 0.2, %v1394_v3  ;;  %v1396_v14 = vadd.f32 %v3257_v54, %v1326_v30 }
 0x2a8   : > { %v1523_v39 = vmul.f32 0.2, %v1395_v34  ;;  %v1584_v38 = vsel %vm1456_vm8, %v1392_v59, %v1520_v23  ;;  %v1585_v32 = vsel %vm1457_vm9, %v1393_v61, %v1521_v5  ;;  %v1397_v52 = vadd.f32 %v3257_v54, %v1327_v11 }
 0x2a9   : > { %v2347_v41 = vpack.c.bf16 %v1585_v32, %v1584_v38  ;;  %v1586_v48 = vsel %vm1458_vm10, %v1394_v3, %v1522_v25  ;;  %v1328_v9 = vmul.f32 %v3241_v58, %v3635_v55  ;;  %vm1460_vm12 = vcmp.ge.f32.partialorder %v1396_v14, 0.0 }
 0x2aa   : > { %v1587_v24 = vsel %vm1459_vm11, %v1395_v34, %v1523_v39  ;;  %vm1461_vm13 = vcmp.ge.f32.partialorder %v1397_v52, 0.0  ;;  %v1524_v20 = vmul.f32 0.2, %v1396_v14  ;;  %v1525_v0 = vmul.f32 0.2, %v1397_v52 }
 0x2ab   : > { %v2352_v42 = vpack.c.bf16 %v1587_v24, %v1586_v48  ;;  %2391 = vst [vmem:[%s3546_s4 + $0xe0] sm:$0xff] %v2347_v41   ;;  %v1329_v13 = vmul.f32 %v3241_v58, %v3636_v28  ;;  %v1398_v4 = vadd.f32 %v3257_v54, %v1328_v9 }
 0x2ac   : > { %v1588_v40 = vsel %vm1460_vm12, %v1396_v14, %v1524_v20  ;;  %v1589_v46 = vsel %vm1461_vm13, %v1397_v52, %v1525_v0 }
 0x2ad   : > { %2392 = vst [vmem:[%s3546_s4 + $0xe8] sm:$0xff] %v2352_v42   ;;  %v1399_v19 = vadd.f32 %v3257_v54, %v1329_v13  ;;  %vm1462_vm14 = vcmp.ge.f32.partialorder %v1398_v4, 0.0  ;;  %v1526_v12 = vmul.f32 0.2, %v1398_v4  ;;  %v2357_v50 = vpack.c.bf16 %v1589_v46, %v1588_v40 }
 0x2af   : > { %vm1463_vm15 = vcmp.ge.f32.partialorder %v1399_v19, 0.0  ;;  %v1527_v7 = vmul.f32 0.2, %v1399_v19  ;;  %v1590_v62 = vsel %vm1462_vm14, %v1398_v4, %v1526_v12  ;;  %2393 = vst [vmem:[%s3546_s4 + $0xf0] sm:$0xff] %v2357_v50  }
 0x2b1   : > { %v1591_v58 = vsel %vm1463_vm15, %v1399_v19, %v1527_v7 }
 0x2b2   : > { %v2362_v36 = vpack.c.bf16 %v1591_v58, %v1590_v62 }
 0x2b4   : > { %2394 = vst [vmem:[%s3546_s4 + $0xf8] sm:$0xff] %v2362_v36  }
 0x2b5 PF: > { %s14_s17 = sadd.s32 1, %s2589_s17   ;;  %s3637_s15 = smov %s2585_s16 }
 0x2b6   : > { %p11_p7 = scmp.ge.s32.totalorder %s14_s17, 4   ;;  %s3638_s16 = smov %s3640_s18 }
 0x2b8   :  { %13 = sbr.rel (!%p11_p7) target bundleno = 2 (0x2), region = 78 }

// kernel: vanilla_encoder_1d_forward.5
= control target key start
LH: loop header
LB: loop body
LE: loop exit
PB: predicated region body
PF: predicated region fallthrough
CT: control target
= control target key end

     0   :  { %8 = vsyncpa [#allocation3], 0  ;;  %s770_s0 = inlined_call_operand.vmem [shape: bf16[2,16,256], index: 0, kind: input, shape index: {}]   ;;  %s771_s1 = inlined_call_operand.vmem [shape: bf16[256,128], index: 1, kind: input, shape index: {}]   ;;  %s772_s2 = inlined_call_operand.vmem [shape: f32[1,128], index: 2, kind: input, shape index: {}]   ;;  %s773_s3 = inlined_call_operand.hbm [shape: f32[2,1,128], index: 3, kind: output, shape index: {}]  }
   0x1   :  { %10 = vsyncpa [#allocation3 + $0x1], 0  ;;  %s619_s12 = smov 0   ;;  %s621_s13 = smov 0  }
   0x2   :  { %s623_s14 = smov 0   ;;  %s625_s15 = smov 0  }
   0x3 LB: > { %s640_s16 = sadd.s32 4294967295, %s596_s15   ;;  %s431_s17 = sadd.s32 4294967294, %s596_s15   ;;  %s596_s15 = sphi %s625_s15, %s779_s15   ;;  %s592_s14 = sphi %s623_s14, %s778_s14   ;;  %s588_s13 = sphi %s621_s13, %s777_s13   ;;  %s584_s12 = sphi %s619_s12, %s776_s12  }
   0x4   : > { %s644_s18 = sadd.s32 1, %s596_s15   ;;  %s91_s19 = sadd.s32 1, %s592_s14 }
   0x5   : > { %s88_s20 = ssub.s32 %s596_s15, %s644_s18  ;;  %p101_p0 = scmp.ne.s32.totalorder %s592_s14, %s588_s13 }
   0x6   : > { %p89_p1 = scmp.eq.s32.totalorder %s88_s20, 0  ;;  %p102_p2 = scmp.eq.s32.totalorder %s640_s16, 1 }
   0x7   : > { %p107_p3 = scmp.ne.s32.totalorder %s588_s13, %s584_s12  ;;  %p108_p4 = scmp.eq.s32.totalorder %s431_s17, 1 }
   0x8   : > { %s655_s21 = scalar_select %p89_p1, %s592_s14, %s91_s19  }
   0x9   : > { %p657_p5 = por %p102_p2, %p101_p0  ;;  %p661_p6 = por %p108_p4, %p107_p3 }
   0xa   : > { %p434_p7 = scmp.ge.s32.totalorder %s596_s15, 1  ;;  %p140_p8 = scmp.lt.s32.totalorder %s596_s15, 3 }
   0xc   : > { %p141_p9 = pnand %p434_p7, %p140_p8 }
   0xd   : > { %v518_v0 = vld [vmem:[%s771_s1 + $0x40] sm:$0xff] (!%p141_p9)   ;;  %v520_v2 = vld [vmem:[%s771_s1 + $0x48] sm:$0xff] (!%p141_p9)   ;;  %p163_p10 = scmp.lt.s32.totalorder (!%p141_p9), %s640_s16, 1  ;;  %v522_v4 = vld [vmem:[%s771_s1 + $0x50] sm:$0xff] (!%p141_p9)   ;;  %s161_s25 = sand.u32 (!%p141_p9), 1, %s588_s13  }
   0xe   : > { %144 = sbr.rel (%p141_p9) target bundleno = 278 (0x116), region = 32  ;;  %v519_v1 = vld [vmem:[%s771_s1] sm:$0xff] (!%p141_p9)   ;;  %457 = vmatprep.subr.bf16.mxu0 (!%p141_p9), %v518_v0  ;;  %v521_v3 = vld [vmem:[%s771_s1 + $0x8] sm:$0xff] (!%p141_p9)   ;;  %v523_v5 = vld [vmem:[%s771_s1 + $0x10] sm:$0xff] (!%p141_p9)   ;;  %s162_s29 = scalar_lea.vmem (!%p141_p9), [#allocation2], %s161_s25 }
   0xf   : > { %458 = vmatpush3.bf16.msra.mxu0 (!%p141_p9), %v519_v1  ;;  %v524_v6 = vld [vmem:[%s771_s1 + $0x58] sm:$0xff] (!%p141_p9)   ;;  %v526_v8 = vld [vmem:[%s771_s1 + $0x60] sm:$0xff] (!%p141_p9)   ;;  %v528_v10 = vld [vmem:[%s771_s1 + $0x68] sm:$0xff] (!%p141_p9)   ;;  %s376_s30 = sshll.u32 (!%p141_p9), %s162_s29, 4  ;;  %s730_s30 = int_to_ptr.vmem [resolvable:$true] %s376_s30 }
  0x10   : > { %459 = vmatprep.subr.bf16.mxu0 (!%p141_p9), %v520_v2  ;;  %v525_v7 = vld [vmem:[%s771_s1 + $0x18] sm:$0xff] (!%p141_p9)   ;;  %v527_v9 = vld [vmem:[%s771_s1 + $0x20] sm:$0xff] (!%p141_p9)   ;;  %v529_v17 = vld [vmem:[%s771_s1 + $0x28] sm:$0xff] (!%p141_p9)   ;;  %s534_s8 = scalar_lea.vmem (!%p141_p9), %s730_s30, 16 }
  0x11   : > { %v530_v20 = vld [vmem:[%s771_s1 + $0x70] sm:$0xff] (!%p141_p9)   ;;  %v532_v26 = vld [vmem:[%s771_s1 + $0x78] sm:$0xff] (!%p141_p9)   ;;  %v225_v41 = vld [vmem:[%s772_s2] sm:$0x1] (!%p141_p9)  ;;  %p535_p11 = scmp.ne.s32.totalorder (!%p141_p9), %s730_s30, %s534_s8 }
  0x12   : > { %v531_v23 = vld [vmem:[%s771_s1 + $0x30] sm:$0xff] (!%p141_p9)   ;;  %v533_v29 = vld [vmem:[%s771_s1 + $0x38] sm:$0xff] (!%p141_p9)  }
  0x13   : > { %460 = vmatpush3.bf16.msra.mxu0 (!%p141_p9), %v521_v3  ;;  %p536_p12 = pnand (!%p141_p9), %p535_p11, %p657_p5 }
  0x14   : > { %461 = vmatprep.subr.bf16.mxu0 (!%p141_p9), %v522_v4 }
  0x15   : > { %s164_s7 = scalar_select %p163_p10, %s640_s16, 1 }
  0x16   : > { %p537_p13 = pneg %p536_p12 }
  0x17   : > { %s456_s17 = sshll.u32 %s164_s7, 4  ;;  %462 = vmatpush3.bf16.msra.mxu0 %v523_v5  ;;  %s364_s7 = scalar_lea.sflag [#allocation3], %s161_s25 }
  0x18   : > { %463 = vmatprep.subr.bf16.mxu0 %v524_v6  ;;  %s167_s28 = scalar_lea.vmem %s770_s0, %s456_s17 }
  0x19   : > { %v169_v11 = vld [vmem:[%s167_s28] sm:$0xff]  ;;  %v170_v12 = vld [vmem:[%s167_s28 + $0x8] sm:$0xff]  ;;  %s453_s28 = sshll.u32 %s640_s16, 4  ;;  %s598_s16 = smov [#allocation2]  }
  0x1a   : > { %v171_v13 = vunpack.c.l.bf16 %v169_v11  ;;  %v172_v14 = vunpack.c.h.bf16 %v169_v11  ;;  %v173_v15 = vunpack.c.l.bf16 %v170_v12  ;;  %v174_v16 = vunpack.c.h.bf16 %v170_v12  ;;  %s728_s6 = scalar_lea.hbm %s773_s3, %s453_s28  ;;  %s538_s9 = sshll.u32 %s598_s16, 4  ;;  %s539_s9 = int_to_ptr.vmem [resolvable:$false] %s538_s9 }
  0x1b   : > { %464 = vmatpush3.bf16.msra.mxu0 %v525_v7  ;;  %s540_s10 = scalar_lea.vmem %s539_s9, 32  ;;  %p541_p0 = scmp.lt.s32.totalorder %s730_s30, %s539_s9 }
  0x1c   : > { %465 = vmatprep.subr.bf16.mxu0 %v526_v8  ;;  %v182_v18 = vadd.f32 %v174_v16, %v172_v14  ;;  %v175_v19 = vadd.f32 %v173_v15, %v171_v13  ;;  %p542_p1 = scmp.lt.s32.totalorder %s540_s10, %s534_s8 }
  0x1e   : > { %v183_v21 = vrot.slane %v182_v18, 4  ;;  %v176_v22 = vrot.slane %v175_v19, 4  ;;  %p543_p2 = por %p542_p1, %p541_p0 }
  0x1f   : > { %466 = vmatpush3.bf16.msra.mxu0 %v527_v9 }
  0x20   : > { %467 = vmatprep.subr.bf16.mxu0 %v528_v10  ;;  %v184_v24 = vadd.f32 %v183_v21, %v182_v18  ;;  %v177_v25 = vadd.f32 %v176_v22, %v175_v19  ;;  %p544_p3 = pnand %p543_p2, %p537_p13 }
  0x22   : > { %v185_v27 = vrot.slane %v184_v24, 2  ;;  %v178_v28 = vrot.slane %v177_v25, 2 }
  0x23   : > { %468 = vmatpush3.bf16.msra.mxu0 %v529_v17 }
  0x24   : > { %469 = vmatprep.subr.bf16.mxu0 %v530_v20  ;;  %v186_v30 = vadd.f32 %v185_v27, %v184_v24  ;;  %v179_v31 = vadd.f32 %v178_v28, %v177_v25 }
  0x26   : > { %v187_v32 = vrot.slane %v186_v30, 1  ;;  %v180_v33 = vrot.slane %v179_v31, 1 }
  0x27   : > { %470 = vmatpush3.bf16.msra.mxu0 %v531_v23 }
  0x28   : > { %471 = vmatprep.subr.bf16.mxu0 %v532_v26  ;;  %v188_v34 = vadd.f32 %v187_v32, %v186_v30  ;;  %v181_v35 = vadd.f32 %v180_v33, %v179_v31 }
  0x2a   : > { %v190_v36 = vmul.f32 0.0625, %v188_v34  ;;  %v189_v37 = vmul.f32 0.0625, %v181_v35 }
  0x2b   : > { %472 = vmatpush3.bf16.msra.mxu0 %v533_v29 }
  0x2c   : > { %v192_v38 = vpack.c.bf16 %v190_v36, %v190_v36  ;;  %v191_v39 = vpack.c.bf16 %v189_v37, %v189_v37 }
  0x2e   : > { %354 = vmatprep.mubr.bf16.mxu0 %v192_v38 }
  0x2f   : > { %355 = vmatmul.mubr.bf16.vlgmr.msra.gmra.mrb[0].mxu0 %v191_v39 }
 0x102   : > { %v473_v40 = vpop.f32.mrb[0].mxu0 }
 0x103   : > { %v474_v42 = vpop.f32.mrb[1].mxu0 }
 0x104   : > { %v475_v43 = vadd.f32 %v474_v42, %v473_v40  ;;  %v476_v44 = vpop.f32.mrb[2].mxu0 }
 0x105   : > { %v477_v45 = vpop.f32.mrb[3].mxu0 }
 0x106   : > { %v357_v46 = vadd.f32 %v475_v43, %v225_v41 }
 0x108   : > { %362 = vst [vmem:[%s162_s29] sm:$0x1] %v357_v46 }
 0x109   : > { %547 = shalt.err (!%p544_p3)
}
 0x10a   : > { %s548_s11 = scalar_lea.hbm %s728_s6, 16  ;;  %s552_s20 = scalar_lea.hbm %s773_s3, 32 }
 0x10b   : > { %p549_p4 = scmp.ne.s32.totalorder %s728_s6, %s548_s11  ;;  %p553_p9 = scmp.lt.u32.totalorder %s728_s6, %s773_s3 }
 0x10c   : > { %p554_p10 = scmp.lt.u32.totalorder %s552_s20, %s548_s11  ;;  %p556_p12 = scmp.lt.u32.totalorder %s548_s11, %s728_s6 }
 0x10d   : > { %p550_p7 = pnand %p549_p4, %p657_p5 }
 0x10e   : > { %p555_p11 = por %p554_p10, %p553_p9 }
 0x10f   : > { %p551_p8 = pneg %p550_p7 }
 0x110   : > { %p557_p13 = por %p556_p12, %p555_p11 }
 0x112   : > { %p558_p0 = pnand %p557_p13, %p551_p8 }
 0x114   : > { %561 = shalt.err (!%p558_p0)
}
 0x115   : > { %479 = dma.vmem_to_hbm [thread:$0]  (%p657_p5), %s730_s30, 16, %s728_s6, %s364_s7  }
 0x116 PF: > { %p485_p1 = scmp.ge.s32.totalorder %s596_s15, 2  ;;  %s388_s26 = sand.u32 1, %s584_s12  }
 0x117   : > { %s389_s27 = scalar_lea.sflag [#allocation3], %s388_s26 }
 0x118   : > { %p482_p2 = pnand %p485_p1, %p661_p6 }
 0x11a   : > { %579 = dma.done.wait (!%p482_p2), %s389_s27, 16  }
 0x11b   : > { %581 = vsyncadd (!%p482_p2), %s389_s27, 4294967280  ;;  %p13_p3 = scmp.ge.s32.totalorder %s644_s18, 4   ;;  %s776_s12 = smov %s588_s13 }
 0x11c   : > { %s777_s13 = smov %s592_s14  ;;  %s778_s14 = smov %s655_s21 }
 0x11d   : > { %s779_s15 = smov %s644_s18  ;;  %15 = sbr.rel (!%p13_p3) target bundleno = 3 (0x3), region = 67 }
 0x124   :  { %393 = vsyncpa [#allocation3], 1 }
 0x125   :  { %395 = vsyncpa [#allocation3 + $0x1], 1 }

</bundles_post_ra>
